<compile_context>
chip_gen: v5e
topology: v5e:2x2
jax: 0.10.0
libtpu: 0.0.40
codegen_flags: <defaults>
</compile_context>

<pallas_src>
import functools

import jax
import jax.numpy as jnp
from jax import lax
from jax.experimental import pallas as pl
from jax.experimental.pallas import tpu as pltpu

KH = KW = 4
EPS = 1e-5
NEG_SLOPE = 0.2


def _round_up(x, m):
    return ((x + m - 1) // m) * m


def _cdiv(a, b):
    return (a + b - 1) // b


def _vmem_capacity_bytes():
    """Per-core VMEM capacity; conservative (v7x-sized) fallback if unknown."""
    try:
        cap = int(pltpu.get_tpu_info().vmem_capacity_bytes)
        if cap > 0:
            return cap
    except Exception:
        pass
    return 64 * 1024 * 1024


def _conv_plan(ho, wo, c4, cp):
    """Pick the output-row tile `toh` and an explicit VMEM limit.

    The s2d sample stays fully resident per batch element (its lane dim is
    padded to 128 in VMEM), so the planner keeps the estimated footprint
    (double buffers + in-kernel f32 temporaries) well inside per-generation
    VMEM and returns an explicit vmem_limit_bytes.
    """
    cap = _vmem_capacity_bytes()
    vmem_limit = int(min(cap * 3 // 4, 112 * 1024 * 1024))
    budget = int(vmem_limit * 0.6)
    # Larger row tiles on 128-MiB parts (v5e/v6e); conservative cap for v7x.
    max_rows = 32768 if cap >= 96 * 1024 * 1024 else 8192

    ws = wo + 1
    c4_lane = max(_round_up(c4, 128), 128)
    ws_sub = _round_up(ws, 8)

    def est(toh):
        n_t = _cdiv(ho, toh)
        hs_pad = n_t * toh + 1
        m_sub = _round_up(toh * wo, 8)
        x_b = 2 * hs_pad * ws_sub * c4_lane * 2          # resident s2d sample, 2 bufs
        w_b = 2 * 4 * _round_up(c4, 8) * cp * 2          # resident taps, 2 bufs
        y_b = 2 * m_sub * cp * 2                         # bf16 output tile, 2 bufs
        tmp = 3 * m_sub * cp * 4 + 2 * m_sub * c4_lane * 2   # f32 partials + lhs copies
        return x_b + w_b + y_b + tmp

    toh = max(1, min(ho, max_rows // max(wo, 1)))
    while toh > 1 and est(toh) > budget:
        toh = max(1, toh // 2)
    n_t = _cdiv(ho, toh)
    # TODO(synk): for very large first-layer inputs on v7x the fully resident
    # s2d sample can still exceed VMEM; a row-halo (element-indexed) x BlockSpec
    # or a manual double-buffered DMA would be needed there.
    return toh, n_t, vmem_limit


def _choose_m_tile(m):
    for c in (2048, 1024, 512, 256, 128, 64, 32, 16, 8):
        if m % c == 0:
            return c
    return m


# ---------------------------------------------------------------------------
# Kernel 1: conv (4-tap per-tile matmuls over space-to-depth input) + BN stats
# ---------------------------------------------------------------------------
def _conv_stats_kernel(x_ref, w_ref, y_ref, stats_ref, *, ho_total, has_tail):
    # x_ref:     (Hs_pad, Ws, 4*Cin)  bf16  (full padded+s2d sample, resident)
    # w_ref:     (4, 4*Cin, CP)       bf16  (resident; CP = Cout padded to 128)
    # y_ref:     (toh*Wo, CP)         bf16  (lane/sublane-dense tile)
    # stats_ref: (2, CP)              f32   (per-tile sum / sum-of-squares)
    ws = x_ref.shape[1]
    c4 = x_ref.shape[2]
    wo = ws - 1
    m, cp = y_ref.shape
    toh = m // wo
    base = pl.program_id(1) * toh

    # One MXU matmul per tap with M = toh*Wo (per-tile, not per-output-row).
    acc = None
    for dh in (0, 1):
        rows = x_ref[pl.ds(base + dh, toh), :, :]            # (toh, Ws, 4*Cin)
        for dw in (0, 1):
            lhs = rows[:, dw:dw + wo, :].reshape(m, c4)
            part = jnp.dot(lhs, w_ref[2 * dh + dw],
                           preferred_element_type=jnp.float32)
            acc = part if acc is None else acc + part

    y_ref[...] = acc.astype(y_ref.dtype)                     # single dense store

    # BatchNorm partial statistics from the f32 accumulator (tail rows masked).
    if has_tail:
        rid = base + lax.broadcasted_iota(jnp.int32, (m, 1), 0) // wo
        acc = jnp.where(rid < ho_total, acc, 0.0)
    stats_ref[0:1, :] = jnp.sum(acc, axis=0, keepdims=True)
    stats_ref[1:2, :] = jnp.sum(acc * acc, axis=0, keepdims=True)


def conv_stats(xs, w_taps, toh, n_t, ho, vmem_limit):
    N, Hs, Ws, C4 = xs.shape
    CP = w_taps.shape[-1]
    Wo = Ws - 1
    kernel = functools.partial(_conv_stats_kernel, ho_total=ho,
                               has_tail=(n_t * toh != ho))
    y, stats = pl.pallas_call(
        kernel,
        out_shape=(
            jax.ShapeDtypeStruct((N, n_t, toh * Wo, CP), jnp.bfloat16),
            jax.ShapeDtypeStruct((N, n_t, 2, CP), jnp.float32),
        ),
        grid=(N, n_t),
        in_specs=[
            pl.BlockSpec((None, Hs, Ws, C4), lambda n, t: (n, 0, 0, 0)),
            pl.BlockSpec((4, C4, CP), lambda n, t: (0, 0, 0)),
        ],
        out_specs=(
            pl.BlockSpec((None, None, toh * Wo, CP), lambda n, t: (n, t, 0, 0)),
            pl.BlockSpec((None, None, 2, CP), lambda n, t: (n, t, 0, 0)),
        ),
        compiler_params=pltpu.CompilerParams(
            dimension_semantics=("parallel", "parallel"),
            vmem_limit_bytes=vmem_limit),
    )(xs, w_taps)
    # (N, n_t, toh*Wo, CP) -> (N, n_t*toh, Wo, CP): contiguous, free reshape.
    return y.reshape(N, n_t * toh, Wo, CP), stats


# ---------------------------------------------------------------------------
# Kernel 2: fused affine BatchNorm (+ optional LeakyReLU), lane-dense output.
# Used only for the final layer; layers 1-3 fuse this into the next s2d prep.
# ---------------------------------------------------------------------------
def _bn_act_kernel(y_ref, scale_ref, shift_ref, o_ref, *, apply_act):
    z = y_ref[...].astype(jnp.float32) * scale_ref[...] + shift_ref[...]
    if apply_act:
        z = jnp.where(z >= 0.0, z, NEG_SLOPE * z)
    o_ref[...] = z                                           # lane-dense (tm, 128)


def bn_act(y2, scale, shift, apply_act):
    M, CP = y2.shape
    tm = _choose_m_tile(M)
    return pl.pallas_call(
        functools.partial(_bn_act_kernel, apply_act=apply_act),
        out_shape=jax.ShapeDtypeStruct((M, CP), jnp.float32),
        grid=(M // tm,),
        in_specs=[
            pl.BlockSpec((tm, CP), lambda i: (i, 0)),
            pl.BlockSpec((1, CP), lambda i: (0, 0)),
            pl.BlockSpec((1, CP), lambda i: (0, 0)),
        ],
        out_specs=pl.BlockSpec((tm, CP), lambda i: (i, 0)),
        compiler_params=pltpu.CompilerParams(
            dimension_semantics=("parallel",)),
    )(y2, scale, shift)


# ---------------------------------------------------------------------------
# XLA glue: pad + space-to-depth prep and weight tap layout.
# ---------------------------------------------------------------------------
def _space_to_depth(a_nhwc, ho_pad):
    """pad=1 + factor-2 space-to-depth (+ bottom zero rows to ho_pad), bf16."""
    N, H, W, C = a_nhwc.shape
    Ho, Wo = H // 2, W // 2
    a = a_nhwc.astype(jnp.bfloat16)
    xp = jnp.pad(a, ((0, 0), (1, 1 + 2 * (ho_pad - Ho)), (1, 1), (0, 0)))
    xs = xp.reshape(N, ho_pad + 1, 2, Wo + 1, 2, C)
    xs = jnp.transpose(xs, (0, 1, 3, 2, 4, 5))               # (N,Hs,Ws,p,q,C)
    return xs.reshape(N, ho_pad + 1, Wo + 1, 4 * C)


def _weights_to_taps(w, cp):
    """(Cout,Cin,4,4) -> (tap=2*dh+dw, (p*2+q)*Cin+cin, CP) bf16, zero-padded."""
    cout, cin = w.shape[0], w.shape[1]
    w_t = jnp.transpose(w, (2, 3, 1, 0))                     # (kh,kw,Cin,Cout)
    w_t = w_t.reshape(2, 2, 2, 2, cin, cout)                 # (dh,p,dw,q,Cin,Cout)
    w_t = jnp.transpose(w_t, (0, 2, 1, 3, 4, 5))             # (dh,dw,p,q,Cin,Cout)
    w_t = w_t.reshape(4, 4 * cin, cout)
    return jnp.pad(w_t, ((0, 0), (0, 0), (0, cp - cout))).astype(jnp.bfloat16)


# ---------------------------------------------------------------------------
# Full forward pass (PyTorch NCHW in / NCHW out; NHWC compute inside).
# ---------------------------------------------------------------------------
def downsampler_px(x_nchw, params):
    a = jnp.transpose(x_nchw, (0, 2, 3, 1)).astype(jnp.float32)
    n_layers = len(params)
    out = None
    for i, (w, gamma, beta) in enumerate(params):
        last = i == n_layers - 1
        N, H, W, Cin = a.shape
        # TODO(synk): odd H/W (asymmetric halo) not supported by the s2d path.
        assert H % 2 == 0 and W % 2 == 0, "even spatial sizes required"
        Ho, Wo = H // 2, W // 2
        Cout = w.shape[0]
        CP = _round_up(Cout, 128)
        C4 = 4 * Cin

        toh, n_t, vmem_limit = _conv_plan(Ho, Wo, C4, CP)
        xs = _space_to_depth(a, n_t * toh)                   # (N,Hs,Ws,4Cin) bf16
        w_taps = _weights_to_taps(w, CP)
        y, stats = conv_stats(xs, w_taps, toh, n_t, Ho, vmem_limit)

        # Training-mode BatchNorm2d batch statistics (biased variance) from the
        # fused per-tile partials.  E[x^2]-mean^2 in f32, clamped at 0.
        M = N * Ho * Wo
        s = jnp.sum(stats, axis=(0, 1))                      # (2, CP)
        mean = s[0] / M
        var = jnp.maximum(s[1] / M - mean * mean, 0.0)
        scale = jnp.pad(gamma, (0, CP - Cout)) * lax.rsqrt(var + EPS)
        shift = jnp.pad(beta, (0, CP - Cout)) - mean * scale

        if not last:
            # Affine + LeakyReLU fused (by XLA) into the next layer's pad +
            # space-to-depth copy: no standalone bn_act HBM round-trip.
            z = (y[:, :Ho, :, :Cout].astype(jnp.float32) * scale[:Cout]
                 + shift[:Cout])
            a = jnp.where(z >= 0.0, z, NEG_SLOPE * z)
        else:
            # Final layer: BN only, lane-dense Pallas kernel; the channel slice
            # + NCHW transpose are one trailing XLA copy.
            Hop = n_t * toh
            o2 = bn_act(y.reshape(N * Hop * Wo, CP),
                        scale.reshape(1, CP).astype(jnp.float32),
                        shift.reshape(1, CP).astype(jnp.float32),
                        apply_act=False)
            out = o2.reshape(N, Hop, Wo, CP)[:, :Ho, :, :Cout]
    return jnp.transpose(out, (0, 3, 1, 2))


def init_params(key, input_channels, num_filters=64):
    # NOTE: the Conv2d bias is intentionally omitted — under training-mode
    # BatchNorm a per-channel constant is exactly cancelled by mean subtraction.
    params = []
    cin = input_channels
    for _ in range(4):
        key, k1 = jax.random.split(key)
        w = jax.random.normal(k1, (num_filters, cin, KH, KW), jnp.float32) * 0.05
        gamma = jnp.ones((num_filters,), jnp.float32)        # PyTorch BN defaults
        beta = jnp.zeros((num_filters,), jnp.float32)
        params.append((w, gamma, beta))
        cin = num_filters
    return params


def reference(x_nchw, params):
    """Pure-XLA reference using the same recipe (bf16 matmuls, f32 batch stats)."""
    a = jnp.transpose(x_nchw, (0, 2, 3, 1)).astype(jnp.float32)
    n_layers = len(params)
    for i, (w, gamma, beta) in enumerate(params):
        last = i == n_layers - 1
        y32 = lax.conv_general_dilated(
            a.astype(jnp.bfloat16),
            jnp.transpose(w, (2, 3, 1, 0)).astype(jnp.bfloat16),
            window_strides=(2, 2), padding=((1, 1), (1, 1)),
            dimension_numbers=("NHWC", "HWIO", "NHWC"),
            preferred_element_type=jnp.float32)
        mean = jnp.mean(y32, axis=(0, 1, 2))
        var = jnp.maximum(jnp.mean(y32 * y32, axis=(0, 1, 2)) - mean * mean, 0.0)
        scale = gamma * lax.rsqrt(var + EPS)
        shift = beta - mean * scale
        y = y32.astype(jnp.bfloat16).astype(jnp.float32)     # kernel stores y in bf16
        z = y * scale + shift
        a = jnp.where(z >= 0.0, z, NEG_SLOPE * z) if not last else z
    return jnp.transpose(a, (0, 3, 1, 2))


if __name__ == "__main__":
    key = jax.random.PRNGKey(0)
    kx, kp = jax.random.split(key)
    N, Cin, H, W = 2, 4, 16, 16
    x = jax.random.normal(kx, (N, Cin, H, W), jnp.float32)
    params = init_params(kp, Cin, num_filters=64)

    fwd = jax.jit(downsampler_px)
    out = jax.block_until_ready(fwd(x, params))
    assert out.shape == (N, 64, H // 16, W // 16), out.shape
    assert bool(jnp.all(jnp.isfinite(out)))

    ref = jax.block_until_ready(jax.jit(reference)(x, params))
    err = float(jnp.max(jnp.abs(out - ref)))
    assert err < 3e-2, f"max |pallas - reference| = {err}"
    print("KERNEL_OK")
</pallas_src>

<mosaic_0001>
module attributes {stable_mosaic.version = 11 : i64} {
  func.func @_conv_stats_kernel(%arg0: i32, %arg1: i32, %arg2: memref<1x9x9x16xbf16, #tpu.memory_space<vmem>>, %arg3: memref<4x16x128xbf16, #tpu.memory_space<vmem>>, %arg4: memref<1x1x64x128xbf16, #tpu.memory_space<vmem>>, %arg5: memref<1x1x2x128xf32, #tpu.memory_space<vmem>>) attributes {dimension_semantics = [#tpu.dimension_semantics<parallel>, #tpu.dimension_semantics<parallel>], iteration_bounds = array<i64: 2, 1>, scalar_prefetch = 0 : i64, scratch_operands = 0 : i64, tpu.core_type = #tpu.core_type<tc>, window_params = [{transform_indices = @transform_0, window_bounds = array<i64: 1, 9, 9, 16>}, {pipeline_mode = #tpu.pipeline_mode<synchronous>, transform_indices = @transform_1, window_bounds = array<i64: 4, 16, 128>}, {transform_indices = @transform_2, window_bounds = array<i64: 1, 1, 64, 128>}, {transform_indices = @transform_3, window_bounds = array<i64: 1, 1, 2, 128>}]} {
    %c8_i32 = arith.constant 8 : i32
    %0 = arith.muli %arg1, %c8_i32 : i32
    %c0_i32 = arith.constant 0 : i32
    %1 = arith.addi %0, %c0_i32 : i32
    %c0 = arith.constant 0 : index
    %2 = arith.index_cast %1 : i32 to index
    %c0_0 = arith.constant 0 : index
    %c0_1 = arith.constant 0 : index
    %3 = vector.load %arg2[%c0, %2, %c0_0, %c0_1] : memref<1x9x9x16xbf16, #tpu.memory_space<vmem>>, vector<1x8x9x16xbf16>
    %4 = vector.shape_cast %3 : vector<1x8x9x16xbf16> to vector<8x9x16xbf16>
    %5 = vector.extract_strided_slice %4 {offsets = [0, 0, 0], sizes = [8, 8, 16], strides = [1, 1, 1]} : vector<8x9x16xbf16> to vector<8x8x16xbf16>
    %6 = vector.shape_cast %5 : vector<8x8x16xbf16> to vector<64x16xbf16>
    %c0_2 = arith.constant 0 : index
    %c0_3 = arith.constant 0 : index
    %c0_4 = arith.constant 0 : index
    %7 = vector.load %arg3[%c0_2, %c0_3, %c0_4] : memref<4x16x128xbf16, #tpu.memory_space<vmem>>, vector<1x16x128xbf16>
    %8 = vector.shape_cast %7 : vector<1x16x128xbf16> to vector<16x128xbf16>
    %cst = arith.constant dense<0.000000e+00> : vector<64x128xf32>
    %9 = tpu.matmul %6, %8, %cst {dimension_numbers = #tpu.dot_dimension_numbers<[1], [0], [0], [1], [0, 0, 1, 1], [], []>} : vector<64x16xbf16>, vector<16x128xbf16>, vector<64x128xf32> -> vector<64x128xf32>
    %10 = vector.extract_strided_slice %4 {offsets = [0, 1, 0], sizes = [8, 8, 16], strides = [1, 1, 1]} : vector<8x9x16xbf16> to vector<8x8x16xbf16>
    %11 = vector.shape_cast %10 : vector<8x8x16xbf16> to vector<64x16xbf16>
    %c1 = arith.constant 1 : index
    %c0_5 = arith.constant 0 : index
    %c0_6 = arith.constant 0 : index
    %12 = vector.load %arg3[%c1, %c0_5, %c0_6] : memref<4x16x128xbf16, #tpu.memory_space<vmem>>, vector<1x16x128xbf16>
    %13 = vector.shape_cast %12 : vector<1x16x128xbf16> to vector<16x128xbf16>
    %cst_7 = arith.constant dense<0.000000e+00> : vector<64x128xf32>
    %14 = tpu.matmul %11, %13, %cst_7 {dimension_numbers = #tpu.dot_dimension_numbers<[1], [0], [0], [1], [0, 0, 1, 1], [], []>} : vector<64x16xbf16>, vector<16x128xbf16>, vector<64x128xf32> -> vector<64x128xf32>
    %15 = arith.addf %9, %14 : vector<64x128xf32>
    %c1_i32 = arith.constant 1 : i32
    %16 = arith.addi %0, %c1_i32 : i32
    %c0_8 = arith.constant 0 : index
    %17 = arith.index_cast %16 : i32 to index
    %c0_9 = arith.constant 0 : index
    %c0_10 = arith.constant 0 : index
    %18 = vector.load %arg2[%c0_8, %17, %c0_9, %c0_10] : memref<1x9x9x16xbf16, #tpu.memory_space<vmem>>, vector<1x8x9x16xbf16>
    %19 = vector.shape_cast %18 : vector<1x8x9x16xbf16> to vector<8x9x16xbf16>
    %20 = vector.extract_strided_slice %19 {offsets = [0, 0, 0], sizes = [8, 8, 16], strides = [1, 1, 1]} : vector<8x9x16xbf16> to vector<8x8x16xbf16>
    %21 = vector.shape_cast %20 : vector<8x8x16xbf16> to vector<64x16xbf16>
    %c2 = arith.constant 2 : index
    %c0_11 = arith.constant 0 : index
    %c0_12 = arith.constant 0 : index
    %22 = vector.load %arg3[%c2, %c0_11, %c0_12] : memref<4x16x128xbf16, #tpu.memory_space<vmem>>, vector<1x16x128xbf16>
    %23 = vector.shape_cast %22 : vector<1x16x128xbf16> to vector<16x128xbf16>
    %cst_13 = arith.constant dense<0.000000e+00> : vector<64x128xf32>
    %24 = tpu.matmul %21, %23, %cst_13 {dimension_numbers = #tpu.dot_dimension_numbers<[1], [0], [0], [1], [0, 0, 1, 1], [], []>} : vector<64x16xbf16>, vector<16x128xbf16>, vector<64x128xf32> -> vector<64x128xf32>
    %25 = arith.addf %15, %24 : vector<64x128xf32>
    %26 = vector.extract_strided_slice %19 {offsets = [0, 1, 0], sizes = [8, 8, 16], strides = [1, 1, 1]} : vector<8x9x16xbf16> to vector<8x8x16xbf16>
    %27 = vector.shape_cast %26 : vector<8x8x16xbf16> to vector<64x16xbf16>
    %c3 = arith.constant 3 : index
    %c0_14 = arith.constant 0 : index
    %c0_15 = arith.constant 0 : index
    %28 = vector.load %arg3[%c3, %c0_14, %c0_15] : memref<4x16x128xbf16, #tpu.memory_space<vmem>>, vector<1x16x128xbf16>
    %29 = vector.shape_cast %28 : vector<1x16x128xbf16> to vector<16x128xbf16>
    %cst_16 = arith.constant dense<0.000000e+00> : vector<64x128xf32>
    %30 = tpu.matmul %27, %29, %cst_16 {dimension_numbers = #tpu.dot_dimension_numbers<[1], [0], [0], [1], [0, 0, 1, 1], [], []>} : vector<64x16xbf16>, vector<16x128xbf16>, vector<64x128xf32> -> vector<64x128xf32>
    %31 = arith.addf %25, %30 : vector<64x128xf32>
    %32 = arith.truncf %31 : vector<64x128xf32> to vector<64x128xbf16>
    %c0_17 = arith.constant 0 : index
    %c0_18 = arith.constant 0 : index
    %c0_19 = arith.constant 0 : index
    %c0_20 = arith.constant 0 : index
    %33 = vector.load %arg4[%c0_17, %c0_18, %c0_19, %c0_20] : memref<1x1x64x128xbf16, #tpu.memory_space<vmem>>, vector<1x1x64x128xbf16>
    %34 = vector.shape_cast %33 : vector<1x1x64x128xbf16> to vector<64x128xbf16>
    %35 = vector.shape_cast %32 : vector<64x128xbf16> to vector<1x1x64x128xbf16>
    tpu.vector_store %arg4[%c0_17, %c0_18, %c0_19, %c0_20], %35 {strides = array<i32>} : memref<1x1x64x128xbf16, #tpu.memory_space<vmem>>, vector<1x1x64x128xbf16>,
    %cst_21 = arith.constant dense<0.000000e+00> : vector<128xf32>
    %36 = vector.multi_reduction <add>, %31, %cst_21 [0] : vector<64x128xf32> to vector<128xf32>
    %37 = vector.shape_cast %36 : vector<128xf32> to vector<1x128xf32>
    %c0_22 = arith.constant 0 : index
    %c0_23 = arith.constant 0 : index
    %c0_24 = arith.constant 0 : index
    %c0_25 = arith.constant 0 : index
    %38 = vector.load %arg5[%c0_22, %c0_23, %c0_24, %c0_25] : memref<1x1x2x128xf32, #tpu.memory_space<vmem>>, vector<1x1x1x128xf32>
    %39 = vector.shape_cast %38 : vector<1x1x1x128xf32> to vector<1x128xf32>
    %40 = vector.shape_cast %37 : vector<1x128xf32> to vector<1x1x1x128xf32>
    tpu.vector_store %arg5[%c0_22, %c0_23, %c0_24, %c0_25], %40 {strides = array<i32>} : memref<1x1x2x128xf32, #tpu.memory_space<vmem>>, vector<1x1x1x128xf32>,
    %41 = arith.mulf %31, %31 : vector<64x128xf32>
    %cst_26 = arith.constant dense<0.000000e+00> : vector<128xf32>
    %42 = vector.multi_reduction <add>, %41, %cst_26 [0] : vector<64x128xf32> to vector<128xf32>
    %43 = vector.shape_cast %42 : vector<128xf32> to vector<1x128xf32>
    %c0_27 = arith.constant 0 : index
    %c0_28 = arith.constant 0 : index
    %c1_29 = arith.constant 1 : index
    %c0_30 = arith.constant 0 : index
    %44 = vector.load %arg5[%c0_27, %c0_28, %c1_29, %c0_30] : memref<1x1x2x128xf32, #tpu.memory_space<vmem>>, vector<1x1x1x128xf32>
    %45 = vector.shape_cast %44 : vector<1x1x1x128xf32> to vector<1x128xf32>
    %46 = vector.shape_cast %43 : vector<1x128xf32> to vector<1x1x1x128xf32>
    tpu.vector_store %arg5[%c0_27, %c0_28, %c1_29, %c0_30], %46 {strides = array<i32>} : memref<1x1x2x128xf32, #tpu.memory_space<vmem>>, vector<1x1x1x128xf32>,
    return
  }
  func.func @transform_0(%arg0: i32, %arg1: i32) -> (i32, i32, i32, i32) {
    %c0_i32 = arith.constant 0 : i32
    %c0_i32_0 = arith.constant 0 : i32
    %c0_i32_1 = arith.constant 0 : i32
    %c0_i32_2 = arith.constant 0 : i32
    return %arg0, %c0_i32, %c0_i32_0, %c0_i32_1 : i32, i32, i32, i32
  }
  func.func @transform_1(%arg0: i32, %arg1: i32) -> (i32, i32, i32) {
    %c0_i32 = arith.constant 0 : i32
    %c0_i32_0 = arith.constant 0 : i32
    %c0_i32_1 = arith.constant 0 : i32
    %c0_i32_2 = arith.constant 0 : i32
    return %c0_i32, %c0_i32_0, %c0_i32_1 : i32, i32, i32
  }
  func.func @transform_2(%arg0: i32, %arg1: i32) -> (i32, i32, i32, i32) {
    %c0_i32 = arith.constant 0 : i32
    %c0_i32_0 = arith.constant 0 : i32
    %c0_i32_1 = arith.constant 0 : i32
    return %arg0, %arg1, %c0_i32, %c0_i32_0 : i32, i32, i32, i32
  }
  func.func @transform_3(%arg0: i32, %arg1: i32) -> (i32, i32, i32, i32) {
    %c0_i32 = arith.constant 0 : i32
    %c0_i32_0 = arith.constant 0 : i32
    %c0_i32_1 = arith.constant 0 : i32
    return %arg0, %arg1, %c0_i32, %c0_i32_0 : i32, i32, i32, i32
  }
}

module attributes {stable_mosaic.version = 11 : i64} {
  func.func @_conv_stats_kernel(%arg0: i32, %arg1: i32, %arg2: memref<1x5x5x256xbf16, #tpu.memory_space<vmem>>, %arg3: memref<4x256x128xbf16, #tpu.memory_space<vmem>>, %arg4: memref<1x1x16x128xbf16, #tpu.memory_space<vmem>>, %arg5: memref<1x1x2x128xf32, #tpu.memory_space<vmem>>) attributes {dimension_semantics = [#tpu.dimension_semantics<parallel>, #tpu.dimension_semantics<parallel>], iteration_bounds = array<i64: 2, 1>, scalar_prefetch = 0 : i64, scratch_operands = 0 : i64, tpu.core_type = #tpu.core_type<tc>, window_params = [{transform_indices = @transform_0, window_bounds = array<i64: 1, 5, 5, 256>}, {pipeline_mode = #tpu.pipeline_mode<synchronous>, transform_indices = @transform_1, window_bounds = array<i64: 4, 256, 128>}, {transform_indices = @transform_2, window_bounds = array<i64: 1, 1, 16, 128>}, {transform_indices = @transform_3, window_bounds = array<i64: 1, 1, 2, 128>}]} {
    %c4_i32 = arith.constant 4 : i32
    %0 = arith.muli %arg1, %c4_i32 : i32
    %c0_i32 = arith.constant 0 : i32
    %1 = arith.addi %0, %c0_i32 : i32
    %c0 = arith.constant 0 : index
    %2 = arith.index_cast %1 : i32 to index
    %c0_0 = arith.constant 0 : index
    %c0_1 = arith.constant 0 : index
    %3 = vector.load %arg2[%c0, %2, %c0_0, %c0_1] : memref<1x5x5x256xbf16, #tpu.memory_space<vmem>>, vector<1x4x5x256xbf16>
    %4 = vector.shape_cast %3 : vector<1x4x5x256xbf16> to vector<4x5x256xbf16>
    %5 = vector.extract_strided_slice %4 {offsets = [0, 0, 0], sizes = [4, 4, 256], strides = [1, 1, 1]} : vector<4x5x256xbf16> to vector<4x4x256xbf16>
    %6 = vector.shape_cast %5 : vector<4x4x256xbf16> to vector<16x256xbf16>
    %c0_2 = arith.constant 0 : index
    %c0_3 = arith.constant 0 : index
    %c0_4 = arith.constant 0 : index
    %7 = vector.load %arg3[%c0_2, %c0_3, %c0_4] : memref<4x256x128xbf16, #tpu.memory_space<vmem>>, vector<1x256x128xbf16>
    %8 = vector.shape_cast %7 : vector<1x256x128xbf16> to vector<256x128xbf16>
    %cst = arith.constant dense<0.000000e+00> : vector<16x128xf32>
    %9 = tpu.matmul %6, %8, %cst {dimension_numbers = #tpu.dot_dimension_numbers<[1], [0], [0], [1], [0, 0, 1, 1], [], []>} : vector<16x256xbf16>, vector<256x128xbf16>, vector<16x128xf32> -> vector<16x128xf32>
    %10 = vector.extract_strided_slice %4 {offsets = [0, 1, 0], sizes = [4, 4, 256], strides = [1, 1, 1]} : vector<4x5x256xbf16> to vector<4x4x256xbf16>
    %11 = vector.shape_cast %10 : vector<4x4x256xbf16> to vector<16x256xbf16>
    %c1 = arith.constant 1 : index
    %c0_5 = arith.constant 0 : index
    %c0_6 = arith.constant 0 : index
    %12 = vector.load %arg3[%c1, %c0_5, %c0_6] : memref<4x256x128xbf16, #tpu.memory_space<vmem>>, vector<1x256x128xbf16>
    %13 = vector.shape_cast %12 : vector<1x256x128xbf16> to vector<256x128xbf16>
    %cst_7 = arith.constant dense<0.000000e+00> : vector<16x128xf32>
    %14 = tpu.matmul %11, %13, %cst_7 {dimension_numbers = #tpu.dot_dimension_numbers<[1], [0], [0], [1], [0, 0, 1, 1], [], []>} : vector<16x256xbf16>, vector<256x128xbf16>, vector<16x128xf32> -> vector<16x128xf32>
    %15 = arith.addf %9, %14 : vector<16x128xf32>
    %c1_i32 = arith.constant 1 : i32
    %16 = arith.addi %0, %c1_i32 : i32
    %c0_8 = arith.constant 0 : index
    %17 = arith.index_cast %16 : i32 to index
    %c0_9 = arith.constant 0 : index
    %c0_10 = arith.constant 0 : index
    %18 = vector.load %arg2[%c0_8, %17, %c0_9, %c0_10] : memref<1x5x5x256xbf16, #tpu.memory_space<vmem>>, vector<1x4x5x256xbf16>
    %19 = vector.shape_cast %18 : vector<1x4x5x256xbf16> to vector<4x5x256xbf16>
    %20 = vector.extract_strided_slice %19 {offsets = [0, 0, 0], sizes = [4, 4, 256], strides = [1, 1, 1]} : vector<4x5x256xbf16> to vector<4x4x256xbf16>
    %21 = vector.shape_cast %20 : vector<4x4x256xbf16> to vector<16x256xbf16>
    %c2 = arith.constant 2 : index
    %c0_11 = arith.constant 0 : index
    %c0_12 = arith.constant 0 : index
    %22 = vector.load %arg3[%c2, %c0_11, %c0_12] : memref<4x256x128xbf16, #tpu.memory_space<vmem>>, vector<1x256x128xbf16>
    %23 = vector.shape_cast %22 : vector<1x256x128xbf16> to vector<256x128xbf16>
    %cst_13 = arith.constant dense<0.000000e+00> : vector<16x128xf32>
    %24 = tpu.matmul %21, %23, %cst_13 {dimension_numbers = #tpu.dot_dimension_numbers<[1], [0], [0], [1], [0, 0, 1, 1], [], []>} : vector<16x256xbf16>, vector<256x128xbf16>, vector<16x128xf32> -> vector<16x128xf32>
    %25 = arith.addf %15, %24 : vector<16x128xf32>
    %26 = vector.extract_strided_slice %19 {offsets = [0, 1, 0], sizes = [4, 4, 256], strides = [1, 1, 1]} : vector<4x5x256xbf16> to vector<4x4x256xbf16>
    %27 = vector.shape_cast %26 : vector<4x4x256xbf16> to vector<16x256xbf16>
    %c3 = arith.constant 3 : index
    %c0_14 = arith.constant 0 : index
    %c0_15 = arith.constant 0 : index
    %28 = vector.load %arg3[%c3, %c0_14, %c0_15] : memref<4x256x128xbf16, #tpu.memory_space<vmem>>, vector<1x256x128xbf16>
    %29 = vector.shape_cast %28 : vector<1x256x128xbf16> to vector<256x128xbf16>
    %cst_16 = arith.constant dense<0.000000e+00> : vector<16x128xf32>
    %30 = tpu.matmul %27, %29, %cst_16 {dimension_numbers = #tpu.dot_dimension_numbers<[1], [0], [0], [1], [0, 0, 1, 1], [], []>} : vector<16x256xbf16>, vector<256x128xbf16>, vector<16x128xf32> -> vector<16x128xf32>
    %31 = arith.addf %25, %30 : vector<16x128xf32>
    %32 = arith.truncf %31 : vector<16x128xf32> to vector<16x128xbf16>
    %c0_17 = arith.constant 0 : index
    %c0_18 = arith.constant 0 : index
    %c0_19 = arith.constant 0 : index
    %c0_20 = arith.constant 0 : index
    %33 = vector.load %arg4[%c0_17, %c0_18, %c0_19, %c0_20] : memref<1x1x16x128xbf16, #tpu.memory_space<vmem>>, vector<1x1x16x128xbf16>
    %34 = vector.shape_cast %33 : vector<1x1x16x128xbf16> to vector<16x128xbf16>
    %35 = vector.shape_cast %32 : vector<16x128xbf16> to vector<1x1x16x128xbf16>
    tpu.vector_store %arg4[%c0_17, %c0_18, %c0_19, %c0_20], %35 {strides = array<i32>} : memref<1x1x16x128xbf16, #tpu.memory_space<vmem>>, vector<1x1x16x128xbf16>,
    %cst_21 = arith.constant dense<0.000000e+00> : vector<128xf32>
    %36 = vector.multi_reduction <add>, %31, %cst_21 [0] : vector<16x128xf32> to vector<128xf32>
    %37 = vector.shape_cast %36 : vector<128xf32> to vector<1x128xf32>
    %c0_22 = arith.constant 0 : index
    %c0_23 = arith.constant 0 : index
    %c0_24 = arith.constant 0 : index
    %c0_25 = arith.constant 0 : index
    %38 = vector.load %arg5[%c0_22, %c0_23, %c0_24, %c0_25] : memref<1x1x2x128xf32, #tpu.memory_space<vmem>>, vector<1x1x1x128xf32>
    %39 = vector.shape_cast %38 : vector<1x1x1x128xf32> to vector<1x128xf32>
    %40 = vector.shape_cast %37 : vector<1x128xf32> to vector<1x1x1x128xf32>
    tpu.vector_store %arg5[%c0_22, %c0_23, %c0_24, %c0_25], %40 {strides = array<i32>} : memref<1x1x2x128xf32, #tpu.memory_space<vmem>>, vector<1x1x1x128xf32>,
    %41 = arith.mulf %31, %31 : vector<16x128xf32>
    %cst_26 = arith.constant dense<0.000000e+00> : vector<128xf32>
    %42 = vector.multi_reduction <add>, %41, %cst_26 [0] : vector<16x128xf32> to vector<128xf32>
    %43 = vector.shape_cast %42 : vector<128xf32> to vector<1x128xf32>
    %c0_27 = arith.constant 0 : index
    %c0_28 = arith.constant 0 : index
    %c1_29 = arith.constant 1 : index
    %c0_30 = arith.constant 0 : index
    %44 = vector.load %arg5[%c0_27, %c0_28, %c1_29, %c0_30] : memref<1x1x2x128xf32, #tpu.memory_space<vmem>>, vector<1x1x1x128xf32>
    %45 = vector.shape_cast %44 : vector<1x1x1x128xf32> to vector<1x128xf32>
    %46 = vector.shape_cast %43 : vector<1x128xf32> to vector<1x1x1x128xf32>
    tpu.vector_store %arg5[%c0_27, %c0_28, %c1_29, %c0_30], %46 {strides = array<i32>} : memref<1x1x2x128xf32, #tpu.memory_space<vmem>>, vector<1x1x1x128xf32>,
    return
  }
  func.func @transform_0(%arg0: i32, %arg1: i32) -> (i32, i32, i32, i32) {
    %c0_i32 = arith.constant 0 : i32
    %c0_i32_0 = arith.constant 0 : i32
    %c0_i32_1 = arith.constant 0 : i32
    %c0_i32_2 = arith.constant 0 : i32
    return %arg0, %c0_i32, %c0_i32_0, %c0_i32_1 : i32, i32, i32, i32
  }
  func.func @transform_1(%arg0: i32, %arg1: i32) -> (i32, i32, i32) {
    %c0_i32 = arith.constant 0 : i32
    %c0_i32_0 = arith.constant 0 : i32
    %c0_i32_1 = arith.constant 0 : i32
    %c0_i32_2 = arith.constant 0 : i32
    return %c0_i32, %c0_i32_0, %c0_i32_1 : i32, i32, i32
  }
  func.func @transform_2(%arg0: i32, %arg1: i32) -> (i32, i32, i32, i32) {
    %c0_i32 = arith.constant 0 : i32
    %c0_i32_0 = arith.constant 0 : i32
    %c0_i32_1 = arith.constant 0 : i32
    return %arg0, %arg1, %c0_i32, %c0_i32_0 : i32, i32, i32, i32
  }
  func.func @transform_3(%arg0: i32, %arg1: i32) -> (i32, i32, i32, i32) {
    %c0_i32 = arith.constant 0 : i32
    %c0_i32_0 = arith.constant 0 : i32
    %c0_i32_1 = arith.constant 0 : i32
    return %arg0, %arg1, %c0_i32, %c0_i32_0 : i32, i32, i32, i32
  }
}

module attributes {stable_mosaic.version = 11 : i64} {
  func.func @_conv_stats_kernel(%arg0: i32, %arg1: i32, %arg2: memref<1x3x3x256xbf16, #tpu.memory_space<vmem>>, %arg3: memref<4x256x128xbf16, #tpu.memory_space<vmem>>, %arg4: memref<1x1x4x128xbf16, #tpu.memory_space<vmem>>, %arg5: memref<1x1x2x128xf32, #tpu.memory_space<vmem>>) attributes {dimension_semantics = [#tpu.dimension_semantics<parallel>, #tpu.dimension_semantics<parallel>], iteration_bounds = array<i64: 2, 1>, scalar_prefetch = 0 : i64, scratch_operands = 0 : i64, tpu.core_type = #tpu.core_type<tc>, window_params = [{transform_indices = @transform_0, window_bounds = array<i64: 1, 3, 3, 256>}, {pipeline_mode = #tpu.pipeline_mode<synchronous>, transform_indices = @transform_1, window_bounds = array<i64: 4, 256, 128>}, {transform_indices = @transform_2, window_bounds = array<i64: 1, 1, 4, 128>}, {transform_indices = @transform_3, window_bounds = array<i64: 1, 1, 2, 128>}]} {
    %c2_i32 = arith.constant 2 : i32
    %0 = arith.muli %arg1, %c2_i32 : i32
    %c0_i32 = arith.constant 0 : i32
    %1 = arith.addi %0, %c0_i32 : i32
    %c0 = arith.constant 0 : index
    %2 = arith.index_cast %1 : i32 to index
    %c0_0 = arith.constant 0 : index
    %c0_1 = arith.constant 0 : index
    %3 = vector.load %arg2[%c0, %2, %c0_0, %c0_1] : memref<1x3x3x256xbf16, #tpu.memory_space<vmem>>, vector<1x2x3x256xbf16>
    %4 = vector.shape_cast %3 : vector<1x2x3x256xbf16> to vector<2x3x256xbf16>
    %5 = vector.extract_strided_slice %4 {offsets = [0, 0, 0], sizes = [2, 2, 256], strides = [1, 1, 1]} : vector<2x3x256xbf16> to vector<2x2x256xbf16>
    %6 = vector.shape_cast %5 : vector<2x2x256xbf16> to vector<4x256xbf16>
    %c0_2 = arith.constant 0 : index
    %c0_3 = arith.constant 0 : index
    %c0_4 = arith.constant 0 : index
    %7 = vector.load %arg3[%c0_2, %c0_3, %c0_4] : memref<4x256x128xbf16, #tpu.memory_space<vmem>>, vector<1x256x128xbf16>
    %8 = vector.shape_cast %7 : vector<1x256x128xbf16> to vector<256x128xbf16>
    %cst = arith.constant dense<0.000000e+00> : vector<4x128xf32>
    %9 = tpu.matmul %6, %8, %cst {dimension_numbers = #tpu.dot_dimension_numbers<[1], [0], [0], [1], [0, 0, 1, 1], [], []>} : vector<4x256xbf16>, vector<256x128xbf16>, vector<4x128xf32> -> vector<4x128xf32>
    %10 = vector.extract_strided_slice %4 {offsets = [0, 1, 0], sizes = [2, 2, 256], strides = [1, 1, 1]} : vector<2x3x256xbf16> to vector<2x2x256xbf16>
    %11 = vector.shape_cast %10 : vector<2x2x256xbf16> to vector<4x256xbf16>
    %c1 = arith.constant 1 : index
    %c0_5 = arith.constant 0 : index
    %c0_6 = arith.constant 0 : index
    %12 = vector.load %arg3[%c1, %c0_5, %c0_6] : memref<4x256x128xbf16, #tpu.memory_space<vmem>>, vector<1x256x128xbf16>
    %13 = vector.shape_cast %12 : vector<1x256x128xbf16> to vector<256x128xbf16>
    %cst_7 = arith.constant dense<0.000000e+00> : vector<4x128xf32>
    %14 = tpu.matmul %11, %13, %cst_7 {dimension_numbers = #tpu.dot_dimension_numbers<[1], [0], [0], [1], [0, 0, 1, 1], [], []>} : vector<4x256xbf16>, vector<256x128xbf16>, vector<4x128xf32> -> vector<4x128xf32>
    %15 = arith.addf %9, %14 : vector<4x128xf32>
    %c1_i32 = arith.constant 1 : i32
    %16 = arith.addi %0, %c1_i32 : i32
    %c0_8 = arith.constant 0 : index
    %17 = arith.index_cast %16 : i32 to index
    %c0_9 = arith.constant 0 : index
    %c0_10 = arith.constant 0 : index
    %18 = vector.load %arg2[%c0_8, %17, %c0_9, %c0_10] : memref<1x3x3x256xbf16, #tpu.memory_space<vmem>>, vector<1x2x3x256xbf16>
    %19 = vector.shape_cast %18 : vector<1x2x3x256xbf16> to vector<2x3x256xbf16>
    %20 = vector.extract_strided_slice %19 {offsets = [0, 0, 0], sizes = [2, 2, 256], strides = [1, 1, 1]} : vector<2x3x256xbf16> to vector<2x2x256xbf16>
    %21 = vector.shape_cast %20 : vector<2x2x256xbf16> to vector<4x256xbf16>
    %c2 = arith.constant 2 : index
    %c0_11 = arith.constant 0 : index
    %c0_12 = arith.constant 0 : index
    %22 = vector.load %arg3[%c2, %c0_11, %c0_12] : memref<4x256x128xbf16, #tpu.memory_space<vmem>>, vector<1x256x128xbf16>
    %23 = vector.shape_cast %22 : vector<1x256x128xbf16> to vector<256x128xbf16>
    %cst_13 = arith.constant dense<0.000000e+00> : vector<4x128xf32>
    %24 = tpu.matmul %21, %23, %cst_13 {dimension_numbers = #tpu.dot_dimension_numbers<[1], [0], [0], [1], [0, 0, 1, 1], [], []>} : vector<4x256xbf16>, vector<256x128xbf16>, vector<4x128xf32> -> vector<4x128xf32>
    %25 = arith.addf %15, %24 : vector<4x128xf32>
    %26 = vector.extract_strided_slice %19 {offsets = [0, 1, 0], sizes = [2, 2, 256], strides = [1, 1, 1]} : vector<2x3x256xbf16> to vector<2x2x256xbf16>
    %27 = vector.shape_cast %26 : vector<2x2x256xbf16> to vector<4x256xbf16>
    %c3 = arith.constant 3 : index
    %c0_14 = arith.constant 0 : index
    %c0_15 = arith.constant 0 : index
    %28 = vector.load %arg3[%c3, %c0_14, %c0_15] : memref<4x256x128xbf16, #tpu.memory_space<vmem>>, vector<1x256x128xbf16>
    %29 = vector.shape_cast %28 : vector<1x256x128xbf16> to vector<256x128xbf16>
    %cst_16 = arith.constant dense<0.000000e+00> : vector<4x128xf32>
    %30 = tpu.matmul %27, %29, %cst_16 {dimension_numbers = #tpu.dot_dimension_numbers<[1], [0], [0], [1], [0, 0, 1, 1], [], []>} : vector<4x256xbf16>, vector<256x128xbf16>, vector<4x128xf32> -> vector<4x128xf32>
    %31 = arith.addf %25, %30 : vector<4x128xf32>
    %32 = arith.truncf %31 : vector<4x128xf32> to vector<4x128xbf16>
    %c0_17 = arith.constant 0 : index
    %c0_18 = arith.constant 0 : index
    %c0_19 = arith.constant 0 : index
    %c0_20 = arith.constant 0 : index
    %33 = vector.load %arg4[%c0_17, %c0_18, %c0_19, %c0_20] : memref<1x1x4x128xbf16, #tpu.memory_space<vmem>>, vector<1x1x4x128xbf16>
    %34 = vector.shape_cast %33 : vector<1x1x4x128xbf16> to vector<4x128xbf16>
    %35 = vector.shape_cast %32 : vector<4x128xbf16> to vector<1x1x4x128xbf16>
    tpu.vector_store %arg4[%c0_17, %c0_18, %c0_19, %c0_20], %35 {strides = array<i32>} : memref<1x1x4x128xbf16, #tpu.memory_space<vmem>>, vector<1x1x4x128xbf16>,
    %cst_21 = arith.constant dense<0.000000e+00> : vector<128xf32>
    %36 = vector.multi_reduction <add>, %31, %cst_21 [0] : vector<4x128xf32> to vector<128xf32>
    %37 = vector.shape_cast %36 : vector<128xf32> to vector<1x128xf32>
    %c0_22 = arith.constant 0 : index
    %c0_23 = arith.constant 0 : index
    %c0_24 = arith.constant 0 : index
    %c0_25 = arith.constant 0 : index
    %38 = vector.load %arg5[%c0_22, %c0_23, %c0_24, %c0_25] : memref<1x1x2x128xf32, #tpu.memory_space<vmem>>, vector<1x1x1x128xf32>
    %39 = vector.shape_cast %38 : vector<1x1x1x128xf32> to vector<1x128xf32>
    %40 = vector.shape_cast %37 : vector<1x128xf32> to vector<1x1x1x128xf32>
    tpu.vector_store %arg5[%c0_22, %c0_23, %c0_24, %c0_25], %40 {strides = array<i32>} : memref<1x1x2x128xf32, #tpu.memory_space<vmem>>, vector<1x1x1x128xf32>,
    %41 = arith.mulf %31, %31 : vector<4x128xf32>
    %cst_26 = arith.constant dense<0.000000e+00> : vector<128xf32>
    %42 = vector.multi_reduction <add>, %41, %cst_26 [0] : vector<4x128xf32> to vector<128xf32>
    %43 = vector.shape_cast %42 : vector<128xf32> to vector<1x128xf32>
    %c0_27 = arith.constant 0 : index
    %c0_28 = arith.constant 0 : index
    %c1_29 = arith.constant 1 : index
    %c0_30 = arith.constant 0 : index
    %44 = vector.load %arg5[%c0_27, %c0_28, %c1_29, %c0_30] : memref<1x1x2x128xf32, #tpu.memory_space<vmem>>, vector<1x1x1x128xf32>
    %45 = vector.shape_cast %44 : vector<1x1x1x128xf32> to vector<1x128xf32>
    %46 = vector.shape_cast %43 : vector<1x128xf32> to vector<1x1x1x128xf32>
    tpu.vector_store %arg5[%c0_27, %c0_28, %c1_29, %c0_30], %46 {strides = array<i32>} : memref<1x1x2x128xf32, #tpu.memory_space<vmem>>, vector<1x1x1x128xf32>,
    return
  }
  func.func @transform_0(%arg0: i32, %arg1: i32) -> (i32, i32, i32, i32) {
    %c0_i32 = arith.constant 0 : i32
    %c0_i32_0 = arith.constant 0 : i32
    %c0_i32_1 = arith.constant 0 : i32
    %c0_i32_2 = arith.constant 0 : i32
    return %arg0, %c0_i32, %c0_i32_0, %c0_i32_1 : i32, i32, i32, i32
  }
  func.func @transform_1(%arg0: i32, %arg1: i32) -> (i32, i32, i32) {
    %c0_i32 = arith.constant 0 : i32
    %c0_i32_0 = arith.constant 0 : i32
    %c0_i32_1 = arith.constant 0 : i32
    %c0_i32_2 = arith.constant 0 : i32
    return %c0_i32, %c0_i32_0, %c0_i32_1 : i32, i32, i32
  }
  func.func @transform_2(%arg0: i32, %arg1: i32) -> (i32, i32, i32, i32) {
    %c0_i32 = arith.constant 0 : i32
    %c0_i32_0 = arith.constant 0 : i32
    %c0_i32_1 = arith.constant 0 : i32
    return %arg0, %arg1, %c0_i32, %c0_i32_0 : i32, i32, i32, i32
  }
  func.func @transform_3(%arg0: i32, %arg1: i32) -> (i32, i32, i32, i32) {
    %c0_i32 = arith.constant 0 : i32
    %c0_i32_0 = arith.constant 0 : i32
    %c0_i32_1 = arith.constant 0 : i32
    return %arg0, %arg1, %c0_i32, %c0_i32_0 : i32, i32, i32, i32
  }
}

module attributes {stable_mosaic.version = 11 : i64} {
  func.func @_conv_stats_kernel(%arg0: i32, %arg1: i32, %arg2: memref<1x2x2x256xbf16, #tpu.memory_space<vmem>>, %arg3: memref<4x256x128xbf16, #tpu.memory_space<vmem>>, %arg4: memref<1x1x1x128xbf16, #tpu.memory_space<vmem>>, %arg5: memref<1x1x2x128xf32, #tpu.memory_space<vmem>>) attributes {dimension_semantics = [#tpu.dimension_semantics<parallel>, #tpu.dimension_semantics<parallel>], iteration_bounds = array<i64: 2, 1>, scalar_prefetch = 0 : i64, scratch_operands = 0 : i64, tpu.core_type = #tpu.core_type<tc>, window_params = [{transform_indices = @transform_0, window_bounds = array<i64: 1, 2, 2, 256>}, {pipeline_mode = #tpu.pipeline_mode<synchronous>, transform_indices = @transform_1, window_bounds = array<i64: 4, 256, 128>}, {transform_indices = @transform_2, window_bounds = array<i64: 1, 1, 1, 128>}, {transform_indices = @transform_3, window_bounds = array<i64: 1, 1, 2, 128>}]} {
    %c1_i32 = arith.constant 1 : i32
    %0 = arith.muli %arg1, %c1_i32 : i32
    %c0_i32 = arith.constant 0 : i32
    %1 = arith.addi %0, %c0_i32 : i32
    %c0 = arith.constant 0 : index
    %2 = arith.index_cast %1 : i32 to index
    %c0_0 = arith.constant 0 : index
    %c0_1 = arith.constant 0 : index
    %3 = vector.load %arg2[%c0, %2, %c0_0, %c0_1] : memref<1x2x2x256xbf16, #tpu.memory_space<vmem>>, vector<1x1x2x256xbf16>
    %4 = vector.shape_cast %3 : vector<1x1x2x256xbf16> to vector<1x2x256xbf16>
    %5 = vector.extract_strided_slice %4 {offsets = [0, 0, 0], sizes = [1, 1, 256], strides = [1, 1, 1]} : vector<1x2x256xbf16> to vector<1x1x256xbf16>
    %6 = vector.shape_cast %5 : vector<1x1x256xbf16> to vector<1x256xbf16>
    %c0_2 = arith.constant 0 : index
    %c0_3 = arith.constant 0 : index
    %c0_4 = arith.constant 0 : index
    %7 = vector.load %arg3[%c0_2, %c0_3, %c0_4] : memref<4x256x128xbf16, #tpu.memory_space<vmem>>, vector<1x256x128xbf16>
    %8 = vector.shape_cast %7 : vector<1x256x128xbf16> to vector<256x128xbf16>
    %cst = arith.constant dense<0.000000e+00> : vector<1x128xf32>
    %9 = tpu.matmul %6, %8, %cst {dimension_numbers = #tpu.dot_dimension_numbers<[1], [0], [0], [1], [0, 0, 1, 1], [], []>} : vector<1x256xbf16>, vector<256x128xbf16>, vector<1x128xf32> -> vector<1x128xf32>
    %10 = vector.extract_strided_slice %4 {offsets = [0, 1, 0], sizes = [1, 1, 256], strides = [1, 1, 1]} : vector<1x2x256xbf16> to vector<1x1x256xbf16>
    %11 = vector.shape_cast %10 : vector<1x1x256xbf16> to vector<1x256xbf16>
    %c1 = arith.constant 1 : index
    %c0_5 = arith.constant 0 : index
    %c0_6 = arith.constant 0 : index
    %12 = vector.load %arg3[%c1, %c0_5, %c0_6] : memref<4x256x128xbf16, #tpu.memory_space<vmem>>, vector<1x256x128xbf16>
    %13 = vector.shape_cast %12 : vector<1x256x128xbf16> to vector<256x128xbf16>
    %cst_7 = arith.constant dense<0.000000e+00> : vector<1x128xf32>
    %14 = tpu.matmul %11, %13, %cst_7 {dimension_numbers = #tpu.dot_dimension_numbers<[1], [0], [0], [1], [0, 0, 1, 1], [], []>} : vector<1x256xbf16>, vector<256x128xbf16>, vector<1x128xf32> -> vector<1x128xf32>
    %15 = arith.addf %9, %14 : vector<1x128xf32>
    %c1_i32_8 = arith.constant 1 : i32
    %16 = arith.addi %0, %c1_i32_8 : i32
    %c0_9 = arith.constant 0 : index
    %17 = arith.index_cast %16 : i32 to index
    %c0_10 = arith.constant 0 : index
    %c0_11 = arith.constant 0 : index
    %18 = vector.load %arg2[%c0_9, %17, %c0_10, %c0_11] : memref<1x2x2x256xbf16, #tpu.memory_space<vmem>>, vector<1x1x2x256xbf16>
    %19 = vector.shape_cast %18 : vector<1x1x2x256xbf16> to vector<1x2x256xbf16>
    %20 = vector.extract_strided_slice %19 {offsets = [0, 0, 0], sizes = [1, 1, 256], strides = [1, 1, 1]} : vector<1x2x256xbf16> to vector<1x1x256xbf16>
    %21 = vector.shape_cast %20 : vector<1x1x256xbf16> to vector<1x256xbf16>
    %c2 = arith.constant 2 : index
    %c0_12 = arith.constant 0 : index
    %c0_13 = arith.constant 0 : index
    %22 = vector.load %arg3[%c2, %c0_12, %c0_13] : memref<4x256x128xbf16, #tpu.memory_space<vmem>>, vector<1x256x128xbf16>
    %23 = vector.shape_cast %22 : vector<1x256x128xbf16> to vector<256x128xbf16>
    %cst_14 = arith.constant dense<0.000000e+00> : vector<1x128xf32>
    %24 = tpu.matmul %21, %23, %cst_14 {dimension_numbers = #tpu.dot_dimension_numbers<[1], [0], [0], [1], [0, 0, 1, 1], [], []>} : vector<1x256xbf16>, vector<256x128xbf16>, vector<1x128xf32> -> vector<1x128xf32>
    %25 = arith.addf %15, %24 : vector<1x128xf32>
    %26 = vector.extract_strided_slice %19 {offsets = [0, 1, 0], sizes = [1, 1, 256], strides = [1, 1, 1]} : vector<1x2x256xbf16> to vector<1x1x256xbf16>
    %27 = vector.shape_cast %26 : vector<1x1x256xbf16> to vector<1x256xbf16>
    %c3 = arith.constant 3 : index
    %c0_15 = arith.constant 0 : index
    %c0_16 = arith.constant 0 : index
    %28 = vector.load %arg3[%c3, %c0_15, %c0_16] : memref<4x256x128xbf16, #tpu.memory_space<vmem>>, vector<1x256x128xbf16>
    %29 = vector.shape_cast %28 : vector<1x256x128xbf16> to vector<256x128xbf16>
    %cst_17 = arith.constant dense<0.000000e+00> : vector<1x128xf32>
    %30 = tpu.matmul %27, %29, %cst_17 {dimension_numbers = #tpu.dot_dimension_numbers<[1], [0], [0], [1], [0, 0, 1, 1], [], []>} : vector<1x256xbf16>, vector<256x128xbf16>, vector<1x128xf32> -> vector<1x128xf32>
    %31 = arith.addf %25, %30 : vector<1x128xf32>
    %32 = arith.truncf %31 : vector<1x128xf32> to vector<1x128xbf16>
    %c0_18 = arith.constant 0 : index
    %c0_19 = arith.constant 0 : index
    %c0_20 = arith.constant 0 : index
    %c0_21 = arith.constant 0 : index
    %33 = vector.load %arg4[%c0_18, %c0_19, %c0_20, %c0_21] : memref<1x1x1x128xbf16, #tpu.memory_space<vmem>>, vector<1x1x1x128xbf16>
    %34 = vector.shape_cast %33 : vector<1x1x1x128xbf16> to vector<1x128xbf16>
    %35 = vector.shape_cast %32 : vector<1x128xbf16> to vector<1x1x1x128xbf16>
    tpu.vector_store %arg4[%c0_18, %c0_19, %c0_20, %c0_21], %35 {strides = array<i32>} : memref<1x1x1x128xbf16, #tpu.memory_space<vmem>>, vector<1x1x1x128xbf16>,
    %cst_22 = arith.constant dense<0.000000e+00> : vector<128xf32>
    %36 = vector.multi_reduction <add>, %31, %cst_22 [0] : vector<1x128xf32> to vector<128xf32>
    %37 = vector.shape_cast %36 : vector<128xf32> to vector<1x128xf32>
    %c0_23 = arith.constant 0 : index
    %c0_24 = arith.constant 0 : index
    %c0_25 = arith.constant 0 : index
    %c0_26 = arith.constant 0 : index
    %38 = vector.load %arg5[%c0_23, %c0_24, %c0_25, %c0_26] : memref<1x1x2x128xf32, #tpu.memory_space<vmem>>, vector<1x1x1x128xf32>
    %39 = vector.shape_cast %38 : vector<1x1x1x128xf32> to vector<1x128xf32>
    %40 = vector.shape_cast %37 : vector<1x128xf32> to vector<1x1x1x128xf32>
    tpu.vector_store %arg5[%c0_23, %c0_24, %c0_25, %c0_26], %40 {strides = array<i32>} : memref<1x1x2x128xf32, #tpu.memory_space<vmem>>, vector<1x1x1x128xf32>,
    %41 = arith.mulf %31, %31 : vector<1x128xf32>
    %cst_27 = arith.constant dense<0.000000e+00> : vector<128xf32>
    %42 = vector.multi_reduction <add>, %41, %cst_27 [0] : vector<1x128xf32> to vector<128xf32>
    %43 = vector.shape_cast %42 : vector<128xf32> to vector<1x128xf32>
    %c0_28 = arith.constant 0 : index
    %c0_29 = arith.constant 0 : index
    %c1_30 = arith.constant 1 : index
    %c0_31 = arith.constant 0 : index
    %44 = vector.load %arg5[%c0_28, %c0_29, %c1_30, %c0_31] : memref<1x1x2x128xf32, #tpu.memory_space<vmem>>, vector<1x1x1x128xf32>
    %45 = vector.shape_cast %44 : vector<1x1x1x128xf32> to vector<1x128xf32>
    %46 = vector.shape_cast %43 : vector<1x128xf32> to vector<1x1x1x128xf32>
    tpu.vector_store %arg5[%c0_28, %c0_29, %c1_30, %c0_31], %46 {strides = array<i32>} : memref<1x1x2x128xf32, #tpu.memory_space<vmem>>, vector<1x1x1x128xf32>,
    return
  }
  func.func @transform_0(%arg0: i32, %arg1: i32) -> (i32, i32, i32, i32) {
    %c0_i32 = arith.constant 0 : i32
    %c0_i32_0 = arith.constant 0 : i32
    %c0_i32_1 = arith.constant 0 : i32
    %c0_i32_2 = arith.constant 0 : i32
    return %arg0, %c0_i32, %c0_i32_0, %c0_i32_1 : i32, i32, i32, i32
  }
  func.func @transform_1(%arg0: i32, %arg1: i32) -> (i32, i32, i32) {
    %c0_i32 = arith.constant 0 : i32
    %c0_i32_0 = arith.constant 0 : i32
    %c0_i32_1 = arith.constant 0 : i32
    %c0_i32_2 = arith.constant 0 : i32
    return %c0_i32, %c0_i32_0, %c0_i32_1 : i32, i32, i32
  }
  func.func @transform_2(%arg0: i32, %arg1: i32) -> (i32, i32, i32, i32) {
    %c0_i32 = arith.constant 0 : i32
    %c0_i32_0 = arith.constant 0 : i32
    %c0_i32_1 = arith.constant 0 : i32
    return %arg0, %arg1, %c0_i32, %c0_i32_0 : i32, i32, i32, i32
  }
  func.func @transform_3(%arg0: i32, %arg1: i32) -> (i32, i32, i32, i32) {
    %c0_i32 = arith.constant 0 : i32
    %c0_i32_0 = arith.constant 0 : i32
    %c0_i32_1 = arith.constant 0 : i32
    return %arg0, %arg1, %c0_i32, %c0_i32_0 : i32, i32, i32, i32
  }
}

module attributes {stable_mosaic.version = 11 : i64} {
  func.func @_bn_act_kernel(%arg0: i32, %arg1: memref<2x128xbf16, #tpu.memory_space<vmem>>, %arg2: memref<1x128xf32, #tpu.memory_space<vmem>>, %arg3: memref<1x128xf32, #tpu.memory_space<vmem>>, %arg4: memref<2x128xf32, #tpu.memory_space<vmem>>) attributes {dimension_semantics = [#tpu.dimension_semantics<parallel>], iteration_bounds = array<i64: 1>, scalar_prefetch = 0 : i64, scratch_operands = 0 : i64, tpu.core_type = #tpu.core_type<tc>, window_params = [{transform_indices = @transform_0, window_bounds = array<i64: 2, 128>}, {pipeline_mode = #tpu.pipeline_mode<synchronous>, transform_indices = @transform_1, window_bounds = array<i64: 1, 128>}, {pipeline_mode = #tpu.pipeline_mode<synchronous>, transform_indices = @transform_2, window_bounds = array<i64: 1, 128>}, {transform_indices = @transform_3, window_bounds = array<i64: 2, 128>}]} {
    %c0 = arith.constant 0 : index
    %c0_0 = arith.constant 0 : index
    %0 = vector.load %arg1[%c0, %c0_0] : memref<2x128xbf16, #tpu.memory_space<vmem>>, vector<2x128xbf16>
    %1 = arith.extf %0 : vector<2x128xbf16> to vector<2x128xf32>
    %c0_1 = arith.constant 0 : index
    %c0_2 = arith.constant 0 : index
    %2 = vector.load %arg2[%c0_1, %c0_2] : memref<1x128xf32, #tpu.memory_space<vmem>>, vector<1x128xf32>
    %3 = vector.broadcast %2 : vector<1x128xf32> to vector<2x128xf32>
    %4 = arith.mulf %1, %3 : vector<2x128xf32>
    %c0_3 = arith.constant 0 : index
    %c0_4 = arith.constant 0 : index
    %5 = vector.load %arg3[%c0_3, %c0_4] : memref<1x128xf32, #tpu.memory_space<vmem>>, vector<1x128xf32>
    %6 = vector.broadcast %5 : vector<1x128xf32> to vector<2x128xf32>
    %7 = arith.addf %4, %6 : vector<2x128xf32>
    %c0_5 = arith.constant 0 : index
    %c0_6 = arith.constant 0 : index
    %8 = vector.load %arg4[%c0_5, %c0_6] : memref<2x128xf32, #tpu.memory_space<vmem>>, vector<2x128xf32>
    tpu.vector_store %arg4[%c0_5, %c0_6], %7 {strides = array<i32>} : memref<2x128xf32, #tpu.memory_space<vmem>>, vector<2x128xf32>,
    return
  }
  func.func @transform_0(%arg0: i32) -> (i32, i32) {
    %c0_i32 = arith.constant 0 : i32
    %c0_i32_0 = arith.constant 0 : i32
    return %arg0, %c0_i32 : i32, i32
  }
  func.func @transform_1(%arg0: i32) -> (i32, i32) {
    %c0_i32 = arith.constant 0 : i32
    %c0_i32_0 = arith.constant 0 : i32
    %c0_i32_1 = arith.constant 0 : i32
    return %c0_i32, %c0_i32_0 : i32, i32
  }
  func.func @transform_2(%arg0: i32) -> (i32, i32) {
    %c0_i32 = arith.constant 0 : i32
    %c0_i32_0 = arith.constant 0 : i32
    %c0_i32_1 = arith.constant 0 : i32
    return %c0_i32, %c0_i32_0 : i32, i32
  }
  func.func @transform_3(%arg0: i32) -> (i32, i32) {
    %c0_i32 = arith.constant 0 : i32
    %c0_i32_0 = arith.constant 0 : i32
    return %arg0, %c0_i32 : i32, i32
  }
}

</mosaic_0001>

<bundles_post_ra>
// kernel: downsampler_px.5
= control target key start
LH: loop header
LB: loop body
LE: loop exit
PB: predicated region body
PF: predicated region fallthrough
CT: control target
= control target key end

     0   :  { %s1144_s12 = smov 0   ;;  %s1146_s13 = smov 0   ;;  %s1310_s0 = inlined_call_operand.vmem [shape: bf16[2,9,9,16], index: 0, kind: input, shape index: {}]   ;;  %s1311_s1 = inlined_call_operand.vmem [shape: bf16[4,16,128], index: 1, kind: input, shape index: {}]   ;;  %s1312_s2 = inlined_call_operand.vmem [shape: bf16[2,1,64,128], index: 2, kind: output, shape index: {0}]   ;;  %s1313_s3 = inlined_call_operand.vmem [shape: f32[2,1,2,128], index: 3, kind: output, shape index: {1}]  }
   0x1   :  { %s1148_s14 = smov 0  }
   0x2 LB: > { %s26_s15 = sadd.s32 1, %s1118_s13  ;;  %p946_p0 = scmp.ge.s32.totalorder %s1122_s14, 1  ;;  %s1122_s14 = sphi %s1148_s14, %s14_s14   ;;  %s1118_s13 = sphi %s1146_s13, %s1317_s13   ;;  %s1114_s12 = sphi %s1144_s12, %s1316_s12  }
   0x3   : > { %p28_p1 = scmp.ge.s32.totalorder %s26_s15, 2  ;;  %p156_p2 = scmp.lt.s32.totalorder %s1122_s14, 3 }
   0x5   : > { %s1319_s15 = smov (%p28_p1, %s26_s15), 0  ;;  %p157_p3 = pnand %p946_p0, %p156_p2 }
   0x6   : > { %p191_p4 = scmp.lt.s32.totalorder (!%p157_p3), %s1114_s12, 1 }
   0x7   : > { %160 = sbr.rel (%p157_p3) target bundleno = 243 (0xf3), region = 28 }
   0xc   : > { %v1050_v0 = vld [vmem:[%s1311_s1 + $0x10] sm:$0xff]  ;;  %v1044_v1 = vld [vmem:[%s1311_s1] sm:$0xff]  ;;  %v1045_v2 = vld [vmem:[%s1311_s1 + $0x8] sm:$0xff]  ;;  %s1321_s12 = smov (!%p191_p4, %s1114_s12), 1  ;;  %vm371_vm0 = vcmask 130048  }
   0xd   : > { %v1051_v3 = vld [vmem:[%s1311_s1 + $0x18] sm:$0xff]  ;;  %548 = vmatpush.bf16.msra.mxu2 %v1050_v0  ;;  %458 = vmatpush.bf16.msra.mxu1 %v1044_v1  ;;  %s1075_s24 = smul.u32 72, %s1321_s12  ;;  %vm235_vm1 = vsmask.f32 3328  ;;  %vm236_vm2 = vsmask.f32 7440 }
   0xe   : > { %391 = vmatpush.bf16.msra.mxu0 %v1045_v2  ;;  %730 = vmatpush.bf16.msra.mxu3 %v1051_v3  ;;  %vm1201_vm3 = vmor %vm235_vm1, %vm236_vm2  ;;  %s1039_s28 = sshll.u32 %s1321_s12, 5  ;;  %s950_s5 = sshll.u32 %s1321_s12, 1 }
   0xf   : > { %s1180_s27 = scalar_lea.vmem %s1310_s0, %s1075_s24  ;;  %s1291_s4 = scalar_lea.vmem %s1312_s2, %s1039_s28 }
  0x10   : > { %v1005_v4 = vld [vmem:[%s1180_s27 + $0x8] sm:$0xf]  ;;  %v1046_v5 = vld [vmem:[%s1180_s27 + $0xc] sm:$0xf0]  ;;  %v963_v6 = vld [vmem:[%s1180_s27] sm:$0xf]  ;;  %s211_s8 = scalar_lea.vmem %s1313_s3, %s950_s5 }
  0x11   : > { %v1006_v7 = vor.u32 %v1046_v5, %v1005_v4  ;;  %v1040_v8 = vld [vmem:[%s1180_s27 + $0x4] sm:$0xf0]  ;;  %v217_v9 = vld [vmem:[%s1180_s27] sm:$0xf]  ;;  %v218_v10 = vld [vmem:[%s1180_s27 + $0x4] sm:$0x1] }
  0x12   : > { %v964_v11 = vor.u32 %v1040_v8, %v963_v6  ;;  %v219_v12 = vld [vmem:[%s1180_s27 + $0x8] sm:$0xf]  ;;  %v220_v13 = vld [vmem:[%s1180_s27 + $0xc] sm:$0x1]  ;;  %v239_v14 = vshrl.u32 %v217_v9, 16  ;;  %v242_v15 = vshll.u32 %v217_v9, 16 }
  0x13   : > { %1023 = vmatmul.msk.bf16.vlgmr.msra.gmra.mxu2 %vm371_vm0, %v1006_v7  ;;  %v248_v16 = vshll.u32 %v218_v10, 16  ;;  %v253_v17 = vshrl.u32 %v219_v12, 16  ;;  %v256_v18 = vshll.u32 %v219_v12, 16  ;;  %v262_v19 = vshll.u32 %v220_v13, 16  ;;  %v985_v20 = vld [vmem:[%s1180_s27 + $0x8] sm:$0xf] }
  0x14   : > { %981 = vmatmul.msk.bf16.vlgmr.msra.gmra.mxu1 %vm371_vm0, %v964_v11  ;;  %v241_v21 = vrot.slane %v239_v14, 4  ;;  %v244_v22 = vrot.slane %v242_v15, 5  ;;  %v986_v23 = vld [vmem:[%s1180_s27 + $0xc] sm:$0x1]  ;;  %v987_v24 = vld [vmem:[%s1180_s27 + $0x10] sm:$0xf] }
  0x15   : > { %v250_v25 = vrot.slane %v248_v16, 5  ;;  %v255_v26 = vrot.slane %v253_v17, 4  ;;  %v258_v27 = vrot.slane %v256_v18, 5  ;;  %v264_v28 = vrot.slane %v262_v19, 5  ;;  %v988_v29 = vld [vmem:[%s1180_s27 + $0x14] sm:$0x1] }
  0x16   : > { %v245_v30 = vor.u32 %v244_v22, %v241_v21  ;;  %v579_v31 = vshrl.u32 %v985_v20, 16  ;;  %v582_v32 = vshll.u32 %v985_v20, 16  ;;  %v588_v33 = vshll.u32 %v986_v23, 16  ;;  %v1197_v34 = vld [vmem:[%s1180_s27 + $0x18] sm:$0xf] }
  0x17   : > { %v259_v36 = vor.u32 %v258_v27, %v255_v26  ;;  %v593_v37 = vshrl.u32 %v987_v24, 16  ;;  %v596_v38 = vshll.u32 %v987_v24, 16  ;;  %v602_v39 = vshll.u32 %v988_v29, 16  ;;  %v1047_v40 = vld [vmem:[%s1180_s27 + $0x1c] sm:$0xf0] }
  0x18   : > { %v246_v41 = vrot.slane %v245_v30, 4  ;;  %v581_v42 = vrot.slane %v579_v31, 4  ;;  %v584_v43 = vrot.slane %v582_v32, 5  ;;  %v590_v44 = vrot.slane %v588_v33, 5  ;;  %v967_v45 = vld [vmem:[%s1180_s27 + $0x10] sm:$0xf] }
  0x19   : > { %v260_v46 = vrot.slane %v259_v36, 4  ;;  %v595_v47 = vrot.slane %v593_v37, 4  ;;  %v598_v48 = vrot.slane %v596_v38, 5  ;;  %v604_v49 = vrot.slane %v602_v39, 5  ;;  %v1041_v50 = vld [vmem:[%s1180_s27 + $0x14] sm:$0xf0] }
  0x1a   : > { %v251_v51 = vsel %vm1201_vm3, %v246_v41, %v250_v25  ;;  %v585_v52 = vor.u32 %v584_v43, %v581_v42  ;;  %v1010_v53 = vor.u32 %v1047_v40, %v1197_v34  ;;  %v968_v54 = vor.u32 %v1041_v50, %v967_v45  ;;  %v221_v55 = vld [vmem:[%s1180_s27 + $0x10] sm:$0xf]  ;;  %v222_v56 = vld [vmem:[%s1180_s27 + $0x14] sm:$0x1]  ;;  %v223_v57 = vld [vmem:[%s1180_s27 + $0x18] sm:$0xf] }
  0x1b   : > { %v265_v58 = vsel %vm1201_vm3, %v260_v46, %v264_v28  ;;  %v353_v59 = vunpack.c.l.b16 %v251_v51  ;;  %v599_v60 = vor.u32 %v598_v48, %v595_v47  ;;  %v267_v61 = vshrl.u32 %v221_v55, 16  ;;  %v224_v0 = vld [vmem:[%s1180_s27 + $0x1c] sm:$0x1]  ;;  %v989_v7 = vld [vmem:[%s1180_s27 + $0x18] sm:$0xf] }
  0x1c   : > { %v354_v62 = vunpack.c.l.b16 %v265_v58  ;;  %v586_v63 = vrot.slane %v585_v52, 4  ;;  %v270_v1 = vshll.u32 %v221_v55, 16  ;;  %v276_v2 = vshll.u32 %v222_v56, 16  ;;  %v990_v12 = vld [vmem:[%s1180_s27 + $0x1c] sm:$0x1] }
  0x1d   : > { %v600_v3 = vrot.slane %v599_v60, 4  ;;  %v269_v4 = vrot.slane %v267_v61, 4  ;;  %v281_v5 = vshrl.u32 %v223_v57, 16  ;;  %v284_v6 = vshll.u32 %v223_v57, 16  ;;  %v991_v13 = vld [vmem:[%s1180_s27 + $0x20] sm:$0xf] }
  0x1e   : > { %v361_v8 = vpack.c.b16 %v354_v62, %v353_v59  ;;  %v591_v9 = vsel %vm1201_vm3, %v586_v63, %v590_v44  ;;  %v272_v10 = vrot.slane %v270_v1, 5  ;;  %v278_v11 = vrot.slane %v276_v2, 5  ;;  %v992_v23 = vld [vmem:[%s1180_s27 + $0x24] sm:$0x1]  ;;  %v225_v33 = vld [vmem:[%s1180_s27 + $0x20] sm:$0xf] }
  0x1f   : > { %v605_v14 = vsel %vm1201_vm3, %v600_v3, %v604_v49  ;;  %v693_v15 = vunpack.c.l.b16 %v591_v9  ;;  %v283_v16 = vrot.slane %v281_v5, 4  ;;  %v286_v17 = vrot.slane %v284_v6, 5  ;;  %v227_v39 = vld [vmem:[%s1180_s27 + $0x28] sm:$0xf]  ;;  %v1048_v47 = vld [vmem:[%s1180_s27 + $0x2c] sm:$0xf0] }
  0x20   : > { %957 = vmatmul.msk.bf16.vlgmr.msra.gmra.mxu0 %vm371_vm0, %v361_v8  ;;  %v694_v18 = vunpack.c.l.b16 %v605_v14  ;;  %v273_v19 = vor.u32 %v272_v10, %v269_v4  ;;  %v290_v20 = vshll.u32 %v224_v0, 16  ;;  %v607_v21 = vshrl.u32 %v989_v7, 16  ;;  %v1013_v43 = vld [vmem:[%s1180_s27 + $0x28] sm:$0xf]  ;;  %v226_v48 = vld [vmem:[%s1180_s27 + $0x24] sm:$0x1] }
  0x21   : > { %v287_v22 = vor.u32 %v286_v17, %v283_v16  ;;  %v610_v24 = vshll.u32 %v989_v7, 16  ;;  %v616_v25 = vshll.u32 %v990_v12, 16  ;;  %v621_v26 = vshrl.u32 %v991_v13, 16  ;;  %v228_v51 = vld [vmem:[%s1180_s27 + $0x2c] sm:$0x1] }
  0x22   : > { %v701_v27 = vpack.c.b16 %v694_v18, %v693_v15  ;;  %v274_v28 = vrot.slane %v273_v19, 4  ;;  %v292_v29 = vrot.slane %v290_v20, 5  ;;  %v609_v30 = vrot.slane %v607_v21, 4  ;;  %v993_v58 = vld [vmem:[%s1180_s27 + $0x28] sm:$0xf] }
  0x23   : > { %1024 = vmatmul.msk.bf16.gmra.mxu2 %vm371_vm0, %v1010_v53  ;;  %v288_v31 = vrot.slane %v287_v22, 4  ;;  %v612_v32 = vrot.slane %v610_v24, 5  ;;  %v623_v36 = vrot.slane %v621_v26, 4  ;;  %v624_v37 = vshll.u32 %v991_v13, 16  ;;  %v995_v63 = vld [vmem:[%s1180_s27 + $0x30] sm:$0xf] }
  0x24   : > { %1033 = vmatmul.msk.bf16.vlgmr.msra.gmra.mxu3 %vm371_vm0, %v701_v27  ;;  %982 = vmatmul.msk.bf16.gmra.mxu1 %vm371_vm0, %v968_v54  ;;  %v279_v34 = vsel %vm1201_vm3, %v274_v28, %v278_v11  ;;  %v630_v38 = vshll.u32 %v992_v23, 16  ;;  %v618_v42 = vrot.slane %v616_v25, 5  ;;  %v295_v49 = vshrl.u32 %v225_v33, 16  ;;  %v994_v6 = vld [vmem:[%s1180_s27 + $0x2c] sm:$0x1] }
  0x25   : > { %v293_v40 = vsel %vm1201_vm3, %v288_v31, %v292_v29  ;;  %v613_v41 = vor.u32 %v612_v32, %v609_v30  ;;  %v355_v44 = vunpack.c.l.b16 %v279_v34  ;;  %v626_v46 = vrot.slane %v624_v37, 5  ;;  %v971_v11 = vld [vmem:[%s1180_s27 + $0x20] sm:$0xf]  ;;  %v996_v13 = vld [vmem:[%s1180_s27 + $0x34] sm:$0x1] }
  0x26   : > { %v356_v45 = vunpack.c.l.b16 %v293_v40  ;;  %v298_v52 = vshll.u32 %v225_v33, 16  ;;  %v309_v53 = vshrl.u32 %v227_v39, 16  ;;  %v632_v55 = vrot.slane %v630_v38, 5  ;;  %v1042_v16 = vld [vmem:[%s1180_s27 + $0x24] sm:$0xf0] }
  0x27   : > { %v614_v50 = vrot.slane %v613_v41, 4  ;;  %v627_v54 = vor.u32 %v626_v46, %v623_v36  ;;  %v297_v56 = vrot.slane %v295_v49, 4  ;;  %v312_v57 = vshll.u32 %v227_v39, 16  ;;  %v229_v31 = vld [vmem:[%s1180_s27 + $0x30] sm:$0xf] }
  0x28   : > { %v300_v60 = vrot.slane %v298_v52, 5  ;;  %v304_v61 = vshll.u32 %v226_v48, 16  ;;  %v311_v62 = vrot.slane %v309_v53, 4  ;;  %v362_v0 = vpack.c.b16 %v356_v45, %v355_v44  ;;  %v231_v32 = vld [vmem:[%s1180_s27 + $0x38] sm:$0xf] }
  0x29   : > { %v619_v59 = vsel %vm1201_vm3, %v614_v50, %v618_v42  ;;  %v628_v1 = vrot.slane %v627_v54, 4  ;;  %v1014_v2 = vor.u32 %v1048_v47, %v1013_v43  ;;  %v314_v3 = vrot.slane %v312_v57, 5  ;;  %v997_v45 = vld [vmem:[%s1180_s27 + $0x38] sm:$0xf]  ;;  %v999_v46 = vld [vmem:[%s1180_s27 + $0x40] sm:$0xf] }
  0x2a   : > { %v301_v4 = vor.u32 %v300_v60, %v297_v56  ;;  %v318_v5 = vshll.u32 %v228_v51, 16  ;;  %v635_v7 = vshrl.u32 %v993_v58, 16  ;;  %v638_v8 = vshll.u32 %v993_v58, 16  ;;  %v230_v52 = vld [vmem:[%s1180_s27 + $0x34] sm:$0x1] }
  0x2b   : > { %v633_v9 = vsel %vm1201_vm3, %v628_v1, %v632_v55  ;;  %v695_v10 = vunpack.c.l.b16 %v619_v59  ;;  %v315_v12 = vor.u32 %v314_v3, %v311_v62  ;;  %v649_v14 = vshrl.u32 %v995_v63, 16  ;;  %v232_v56 = vld [vmem:[%s1180_s27 + $0x3c] sm:$0x1]  ;;  %v975_v3 = vld [vmem:[%s1180_s27 + $0x30] sm:$0xf] }
  0x2c   : > { %v696_v15 = vunpack.c.l.b16 %v633_v9  ;;  %v306_v17 = vrot.slane %v304_v61, 5  ;;  %v637_v18 = vrot.slane %v635_v7, 4  ;;  %v640_v19 = vrot.slane %v638_v8, 5  ;;  %v998_v8 = vld [vmem:[%s1180_s27 + $0x3c] sm:$0x1] }
  0x2d   : > { %v302_v20 = vrot.slane %v301_v4, 4  ;;  %v644_v21 = vshll.u32 %v994_v6, 16  ;;  %v651_v22 = vrot.slane %v649_v14, 4  ;;  %v652_v23 = vshll.u32 %v995_v63, 16  ;;  %v1017_v63 = vld [vmem:[%s1180_s27 + $0x38] sm:$0xf] }
  0x2e   : > { %v316_v24 = vrot.slane %v315_v12, 4  ;;  %v320_v25 = vrot.slane %v318_v5, 5  ;;  %v641_v26 = vor.u32 %v640_v19, %v637_v18  ;;  %v658_v27 = vshll.u32 %v996_v13, 16  ;;  %v1043_v4 = vld [vmem:[%s1180_s27 + $0x34] sm:$0xf0] }
  0x2f   : > { %v702_v28 = vpack.c.b16 %v696_v15, %v695_v10  ;;  %v972_v29 = vor.u32 %v1042_v16, %v971_v11  ;;  %v654_v30 = vrot.slane %v652_v23, 5  ;;  %v307_v33 = vsel %vm1201_vm3, %v302_v20, %v306_v17  ;;  %v1000_v13 = vld [vmem:[%s1180_s27 + $0x44] sm:$0x1] }
  0x30   : > { %958 = vmatmul.msk.bf16.gmra.mxu0 %vm371_vm0, %v362_v0  ;;  %v646_v34 = vrot.slane %v644_v21, 5  ;;  %v321_v37 = vsel %vm1201_vm3, %v316_v24, %v320_v25  ;;  %v642_v38 = vrot.slane %v641_v26, 4  ;;  %v660_v39 = vrot.slane %v658_v27, 5  ;;  %v1049_v0 = vld [vmem:[%s1180_s27 + $0x3c] sm:$0xf0] }
  0x31   : > { %v655_v36 = vor.u32 %v654_v30, %v651_v22  ;;  %v323_v40 = vshrl.u32 %v229_v31, 16  ;;  %v326_v42 = vshll.u32 %v229_v31, 16  ;;  %v337_v43 = vshrl.u32 %v231_v32, 16 }
  0x32   : > { %v340_v44 = vshll.u32 %v231_v32, 16  ;;  %v357_v47 = vunpack.c.l.b16 %v307_v33  ;;  %v358_v48 = vunpack.c.l.b16 %v321_v37  ;;  %v647_v49 = vsel %vm1201_vm3, %v642_v38, %v646_v34 }
  0x33   : > { %1025 = vmatmul.msk.bf16.gmra.mxu2 %vm371_vm0, %v1014_v2  ;;  %v656_v41 = vrot.slane %v655_v36, 4  ;;  %v325_v50 = vrot.slane %v323_v40, 4  ;;  %v328_v53 = vrot.slane %v326_v42, 5  ;;  %v339_v54 = vrot.slane %v337_v43, 4 }
  0x34   : > { %1034 = vmatmul.msk.bf16.gmra.mxu3 %vm371_vm0, %v702_v28  ;;  %983 = vmatmul.msk.bf16.gmra.mxu1 %vm371_vm0, %v972_v29  ;;  %v342_v55 = vrot.slane %v340_v44, 5  ;;  %v663_v57 = vshrl.u32 %v997_v45, 16  ;;  %v666_v58 = vshll.u32 %v997_v45, 16  ;;  %v677_v59 = vshrl.u32 %v999_v46, 16 }
  0x35   : > { %v661_v51 = vsel %vm1201_vm3, %v656_v41, %v660_v39  ;;  %v680_v60 = vshll.u32 %v999_v46, 16  ;;  %v363_v61 = vpack.c.b16 %v358_v48, %v357_v47  ;;  %v697_v62 = vunpack.c.l.b16 %v647_v49 }
  0x36   : > { %v332_v1 = vshll.u32 %v230_v52, 16  ;;  %v698_v2 = vunpack.c.l.b16 %v661_v51  ;;  %v329_v5 = vor.u32 %v328_v53, %v325_v50  ;;  %v343_v6 = vor.u32 %v342_v55, %v339_v54 }
  0x37   : > { %v346_v7 = vshll.u32 %v232_v56, 16  ;;  %v665_v9 = vrot.slane %v663_v57, 4  ;;  %v668_v10 = vrot.slane %v666_v58, 5  ;;  %v679_v11 = vrot.slane %v677_v59, 4 }
  0x38   : > { %v682_v12 = vrot.slane %v680_v60, 5  ;;  %v1018_v14 = vor.u32 %v1049_v0, %v1017_v63  ;;  %v976_v15 = vor.u32 %v1043_v4, %v975_v3  ;;  %v334_v16 = vrot.slane %v332_v1, 5 }
  0x39   : > { %v703_v17 = vpack.c.b16 %v698_v2, %v697_v62  ;;  %v330_v18 = vrot.slane %v329_v5, 4  ;;  %v348_v19 = vrot.slane %v346_v7, 5  ;;  %v672_v20 = vshll.u32 %v998_v8, 16 }
  0x3a   : > { %v344_v21 = vrot.slane %v343_v6, 4  ;;  %v669_v22 = vor.u32 %v668_v10, %v665_v9  ;;  %v683_v23 = vor.u32 %v682_v12, %v679_v11  ;;  %v686_v24 = vshll.u32 %v1000_v13, 16 }
  0x3b   : > { %v335_v25 = vsel %vm1201_vm3, %v330_v18, %v334_v16  ;;  %v674_v26 = vrot.slane %v672_v20, 5 }
  0x3c   : > { %v349_v27 = vsel %vm1201_vm3, %v344_v21, %v348_v19  ;;  %v670_v28 = vrot.slane %v669_v22, 4  ;;  %v684_v29 = vrot.slane %v683_v23, 4  ;;  %v688_v30 = vrot.slane %v686_v24, 5 }
  0x3d   : > { %v359_v31 = vunpack.c.l.b16 %v335_v25  ;;  %v360_v32 = vunpack.c.l.b16 %v349_v27 }
  0x3e   : > { %v675_v33 = vsel %vm1201_vm3, %v670_v28, %v674_v26  ;;  %v689_v34 = vsel %vm1201_vm3, %v684_v29, %v688_v30 }
  0x3f   : > { %v364_v36 = vpack.c.b16 %v360_v32, %v359_v31  ;;  %v699_v37 = vunpack.c.l.b16 %v675_v33  ;;  %v700_v38 = vunpack.c.l.b16 %v689_v34 }
  0x40   : > { %959 = vmatmul.msk.bf16.gmra.mxu0 %vm371_vm0, %v363_v61 }
  0x41   : > { %v704_v39 = vpack.c.b16 %v700_v38, %v699_v37 }
  0x43   : > { %1026 = vmatmul.msk.bf16.gmra.mxu2 %vm371_vm0, %v1018_v14 }
  0x44   : > { %1035 = vmatmul.msk.bf16.gmra.mxu3 %vm371_vm0, %v703_v17  ;;  %984 = vmatmul.msk.bf16.gmra.mxu1 %vm371_vm0, %v976_v15 }
  0x50   : > { %960 = vmatmul.msk.bf16.gmra.mxu0 %vm371_vm0, %v364_v36 }
  0x54   : > { %1036 = vmatmul.msk.bf16.gmra.mxu3 %vm371_vm0, %v704_v39 }
  0x91   : > { %v460_v40 = vpop.f32.mrf.mxu1 }
  0x96   : > { %v550_v41 = vpop.f32.mrf.mxu2 }
  0x99   : > { %v462_v43 = vpop.f32.mrf.mxu1 }
  0x9d   : > { %v393_v42 = vpop.f32.mrf.mxu0 }
  0x9e   : > { %v552_v44 = vpop.f32.mrf.mxu2  ;;  %v461_v48 = vadd.f32 %v460_v40, %v393_v42 }
  0xa0   : > { %v570_v50 = vadd.f32 %v550_v41, %v461_v48 }
  0xa1   : > { %v465_v47 = vpop.f32.mrf.mxu1 }
  0xa5   : > { %v395_v45 = vpop.f32.mrf.mxu0 }
  0xa6   : > { %v463_v35 = vadd.f32 %v462_v43, %v395_v45  ;;  %v555_v49 = vpop.f32.mrf.mxu2 }
  0xa7   : > { %v732_v46 = vpop.f32.mrf.mxu3 }
  0xa8   : > { %v571_v52 = vadd.f32 %v552_v44, %v463_v35  ;;  %v752_v54 = vadd.f32 %v732_v46, %v570_v50 }
  0xa9   : > { %v467_v56 = vpop.f32.mrf.mxu1 }
  0xaa   : > { %v790_v25 = vmul.f32 %v752_v54, %v752_v54 }
  0xad   : > { %v398_v51 = vpop.f32.mrf.mxu0 }
  0xae   : > { %v557_v58 = vpop.f32.mrf.mxu2  ;;  %v466_v61 = vadd.f32 %v465_v47, %v398_v51 }
  0xaf   : > { %v734_v53 = vpop.f32.mrf.mxu3 }
  0xb0   : > { %v753_v55 = vadd.f32 %v734_v53, %v571_v52  ;;  %v572_v0 = vadd.f32 %v555_v49, %v466_v61 }
  0xb1   : > { %v470_v63 = vpop.f32.mrf.mxu1 }
  0xb2   : > { %v1055_v57 = vpack.c.bf16 %v753_v55, %v752_v54  ;;  %v791_v23 = vmul.f32 %v753_v55, %v753_v55  ;;  %v776_v27 = vadd.f32 %v753_v55, %v752_v54 }
  0xb4   : > { %1056 = vst [vmem:[%s1291_s4] sm:$0xff] %v1055_v57   ;;  %v798_v29 = vadd.f32 %v791_v23, %v790_v25 }
  0xb5   : > { %v400_v59 = vpop.f32.mrf.mxu0 }
  0xb6   : > { %v468_v62 = vadd.f32 %v467_v56, %v400_v59  ;;  %v560_v3 = vpop.f32.mrf.mxu2 }
  0xb7   : > { %v737_v60 = vpop.f32.mrf.mxu3 }
  0xb8   : > { %v573_v2 = vadd.f32 %v557_v58, %v468_v62  ;;  %v754_v5 = vadd.f32 %v737_v60, %v572_v0 }
  0xb9   : > { %v472_v8 = vpop.f32.mrf.mxu1 }
  0xba   : > { %v792_v26 = vmul.f32 %v754_v5, %v754_v5  ;;  %v777_v32 = vadd.f32 %v776_v27, %v754_v5 }
  0xbc   : > { %v799_v34 = vadd.f32 %v798_v29, %v792_v26 }
  0xbd   : > { %v403_v1 = vpop.f32.mrf.mxu0 }
  0xbe   : > { %v471_v11 = vadd.f32 %v470_v63, %v403_v1  ;;  %v562_v12 = vpop.f32.mrf.mxu2 }
  0xbf   : > { %v739_v4 = vpop.f32.mrf.mxu3 }
  0xc0   : > { %v755_v6 = vadd.f32 %v739_v4, %v573_v2  ;;  %v574_v14 = vadd.f32 %v560_v3, %v471_v11 }
  0xc1   : > { %v475_v17 = vpop.f32.mrf.mxu1 }
  0xc2   : > { %v1060_v7 = vpack.c.bf16 %v755_v6, %v754_v5  ;;  %v793_v33 = vmul.f32 %v755_v6, %v755_v6  ;;  %v778_v37 = vadd.f32 %v777_v32, %v755_v6 }
  0xc4   : > { %1072 = vst [vmem:[%s1291_s4 + $0x8] sm:$0xff] %v1060_v7   ;;  %v800_v41 = vadd.f32 %v799_v34, %v793_v33 }
  0xc5   : > { %v405_v9 = vpop.f32.mrf.mxu0 }
  0xc6   : > { %v473_v13 = vadd.f32 %v472_v8, %v405_v9  ;;  %v565_v24 = vpop.f32.mrf.mxu2 }
  0xc7   : > { %v742_v10 = vpop.f32.mrf.mxu3 }
  0xc8   : > { %v575_v16 = vadd.f32 %v562_v12, %v473_v13  ;;  %v756_v19 = vadd.f32 %v742_v10, %v574_v14 }
  0xc9   : > { %v477_v36 = vpop.f32.mrf.mxu1 }
  0xca   : > { %v794_v38 = vmul.f32 %v756_v19, %v756_v19  ;;  %v779_v42 = vadd.f32 %v778_v37, %v756_v19 }
  0xcc   : > { %v801_v45 = vadd.f32 %v800_v41, %v794_v38 }
  0xcd   : > { %v408_v15 = vpop.f32.mrf.mxu0 }
  0xce   : > { %v476_v22 = vadd.f32 %v475_v17, %v408_v15  ;;  %v567_v44 = vpop.f32.mrf.mxu2 }
  0xcf   : > { %v744_v18 = vpop.f32.mrf.mxu3 }
  0xd0   : > { %v757_v20 = vadd.f32 %v744_v18, %v575_v16  ;;  %v576_v28 = vadd.f32 %v565_v24, %v476_v22 }
  0xd2   : > { %v1065_v21 = vpack.c.bf16 %v757_v20, %v756_v19  ;;  %v795_v43 = vmul.f32 %v757_v20, %v757_v20  ;;  %v780_v46 = vadd.f32 %v779_v42, %v757_v20 }
  0xd4   : > { %1073 = vst [vmem:[%s1291_s4 + $0x10] sm:$0xff] %v1065_v21   ;;  %v802_v49 = vadd.f32 %v801_v45, %v795_v43 }
  0xd5   : > { %v410_v31 = vpop.f32.mrf.mxu0 }
  0xd6   : > { %v478_v40 = vadd.f32 %v477_v36, %v410_v31 }
  0xd7   : > { %v747_v30 = vpop.f32.mrf.mxu3 }
  0xd8   : > { %v758_v39 = vadd.f32 %v747_v30, %v576_v28  ;;  %v577_v48 = vadd.f32 %v567_v44, %v478_v40 }
  0xda   : > { %v796_v47 = vmul.f32 %v758_v39, %v758_v39  ;;  %v781_v50 = vadd.f32 %v780_v46, %v758_v39 }
  0xdc   : > { %v803_v52 = vadd.f32 %v802_v49, %v796_v47 }
  0xdf   : > { %v749_v35 = vpop.f32.mrf.mxu3 }
  0xe0   : > { %v759_v51 = vadd.f32 %v749_v35, %v577_v48 }
  0xe2   : > { %v1070_v53 = vpack.c.bf16 %v759_v51, %v758_v39  ;;  %v782_v54 = vadd.f32 %v781_v50, %v759_v51  ;;  %v797_v55 = vmul.f32 %v759_v51, %v759_v51 }
  0xe4   : > { %1074 = vst [vmem:[%s1291_s4 + $0x18] sm:$0xff] %v1070_v53   ;;  %v783_v56 = vrot.slane %v782_v54, 4  ;;  %v804_v57 = vadd.f32 %v803_v52, %v797_v55 }
  0xe6   : > { %v784_v58 = vadd.f32 %v783_v56, %v782_v54  ;;  %v805_v59 = vrot.slane %v804_v57, 4 }
  0xe8   : > { %v785_v60 = vrot.slane %v784_v58, 2  ;;  %v806_v61 = vadd.f32 %v805_v59, %v804_v57 }
  0xea   : > { %v786_v62 = vadd.f32 %v785_v60, %v784_v58  ;;  %v807_v63 = vrot.slane %v806_v61, 2 }
  0xec   : > { %v787_v0 = vrot.slane %v786_v62, 1  ;;  %v808_v1 = vadd.f32 %v807_v63, %v806_v61 }
  0xee   : > { %v788_v2 = vadd.f32 %v787_v0, %v786_v62  ;;  %v809_v3 = vrot.slane %v808_v1, 1 }
  0xf0   : > { %789 = vst [vmem:[%s211_s8] sm:$0x1] %v788_v2  ;;  %v810_v4 = vadd.f32 %v809_v3, %v808_v1 }
  0xf2   : > { %811 = vst [vmem:[%s211_s8 + $0x1] sm:$0x1] %v810_v4 }
  0xf3 PF: > { %s14_s14 = sadd.s32 1, %s1122_s14   ;;  %s1316_s12 = smov %s1118_s13 }
  0xf4   : > { %p11_p5 = scmp.ge.s32.totalorder %s14_s14, 4   ;;  %s1317_s13 = smov %s1319_s15 }
  0xf6   :  { %13 = sbr.rel (!%p11_p5) target bundleno = 2 (0x2), region = 75 }

// kernel: downsampler_px.6
= control target key start
LH: loop header
LB: loop body
LE: loop exit
PB: predicated region body
PF: predicated region fallthrough
CT: control target
= control target key end

     0   :  { %s1746_s12 = smov 0   ;;  %s1748_s13 = smov 0   ;;  %s2061_s0 = inlined_call_operand.vmem [shape: bf16[2,5,5,256], index: 0, kind: input, shape index: {}]   ;;  %s2062_s1 = inlined_call_operand.vmem [shape: bf16[4,256,128], index: 1, kind: input, shape index: {}]   ;;  %s2063_s2 = inlined_call_operand.vmem [shape: bf16[2,1,16,128], index: 2, kind: output, shape index: {0}]   ;;  %s2064_s3 = inlined_call_operand.vmem [shape: f32[2,1,2,128], index: 3, kind: output, shape index: {1}]  }
   0x1   :  { %s1750_s14 = smov 0  }
   0x2 LB: > { %s26_s15 = sadd.s32 1, %s1720_s13  ;;  %p1244_p0 = scmp.ge.s32.totalorder %s1724_s14, 1  ;;  %s1724_s14 = sphi %s1750_s14, %s14_s14   ;;  %s1720_s13 = sphi %s1748_s13, %s2072_s13   ;;  %s1716_s12 = sphi %s1746_s12, %s2071_s12  }
   0x3   : > { %p28_p1 = scmp.ge.s32.totalorder %s26_s15, 2  ;;  %p156_p2 = scmp.lt.s32.totalorder %s1724_s14, 3 }
   0x5   : > { %s2074_s15 = smov (%p28_p1, %s26_s15), 0  ;;  %p157_p3 = pnand %p1244_p0, %p156_p2 }
   0x6   : > { %p191_p4 = scmp.lt.s32.totalorder (!%p157_p3), %s1716_s12, 1 }
   0x7   : > { %160 = sbr.rel (%p157_p3) target bundleno = 240 (0xf0), region = 28 }
   0xc   : > { %v1631_v0 = vld [vmem:[%s2062_s1 + $0xb8] sm:$0xff]  ;;  %v1630_v4 = vld [vmem:[%s2062_s1 + $0xb0] sm:$0xff]  ;;  %s2076_s12 = smov (!%p191_p4, %s1716_s12), 1  ;;  %v1629_v8 = vld [vmem:[%s2062_s1 + $0xa8] sm:$0xff]  ;;  %vm286_vm0 = vsmask.f32 1280 }
   0xd   : > { %v1639_v1 = vld [vmem:[%s2062_s1 + $0xf8] sm:$0xff]  ;;  %489 = vmatpush.bf16.msra.mxu0 %v1631_v0  ;;  %v1638_v5 = vld [vmem:[%s2062_s1 + $0xf0] sm:$0xff]  ;;  %v1637_v9 = vld [vmem:[%s2062_s1 + $0xe8] sm:$0xff]  ;;  %s1677_s9 = smul.u32 40, %s2076_s12  ;;  %vm228_vm1 = vcmask 1041408   ;;  %vm273_vm4 = vcmask 1043458  }
   0xe   : > { %v1615_v2 = vld [vmem:[%s2062_s1 + $0x38] sm:$0xff]  ;;  %503 = vmatpush.bf16.msra.mxu1 %v1639_v1  ;;  %v1614_v6 = vld [vmem:[%s2062_s1 + $0x30] sm:$0xff]  ;;  %v1613_v10 = vld [vmem:[%s2062_s1 + $0x28] sm:$0xff]  ;;  %vm287_vm2 = vsmask.f32 3336  ;;  %s1607_s8 = sshll.u32 %s2076_s12, 3 }
   0xf   : > { %v1623_v3 = vld [vmem:[%s2062_s1 + $0x78] sm:$0xff]  ;;  %624 = vmatpush.bf16.msra.mxu2 %v1615_v2  ;;  %v1622_v7 = vld [vmem:[%s2062_s1 + $0x70] sm:$0xff]  ;;  %v1621_v11 = vld [vmem:[%s2062_s1 + $0x68] sm:$0xff]  ;;  %s1812_s24 = scalar_lea.vmem %s2061_s0, %s1677_s9  ;;  %vm289_vm3 = vsmask.f32 5392  ;;  %s204_s11 = scalar_lea.vmem %s2063_s2, %s1607_s8 }
  0x10   : > { %638 = vmatpush.bf16.msra.mxu3 %v1623_v3  ;;  %v1628_v12 = vld [vmem:[%s2062_s1 + $0xa0] sm:$0xff]  ;;  %v1627_v16 = vld [vmem:[%s2062_s1 + $0x98] sm:$0xff]  ;;  %v217_v19 = vld [vmem:[%s1812_s24 + $0x8] sm:$0x77]  ;;  %vm291_vm5 = vsmask.f32 7448 }
  0x11   : > { %490 = vmatpush.bf16.msra.mxu0 %v1630_v4  ;;  %v1636_v13 = vld [vmem:[%s2062_s1 + $0xe0] sm:$0xff]  ;;  %v1635_v17 = vld [vmem:[%s2062_s1 + $0xd8] sm:$0xff]  ;;  %v218_v20 = vld [vmem:[%s1812_s24 + $0x10] sm:$0x77]  ;;  %v225_v23 = vrot.slane %v217_v19, 2  ;;  %s1248_s16 = sshll.u32 %s2076_s12, 1 }
  0x12   : > { %504 = vmatpush.bf16.msra.mxu1 %v1638_v5  ;;  %v1612_v14 = vld [vmem:[%s2062_s1 + $0x20] sm:$0xff]  ;;  %v219_v21 = vld [vmem:[%s1812_s24 + $0x18] sm:$0x77]  ;;  %v226_v26 = vrot.slane %v218_v20, 2  ;;  %vm1852_vm6 = vmor %vm286_vm0, %vm287_vm2  ;;  %s211_s18 = scalar_lea.vmem %s2064_s3, %s1248_s16 }
  0x13   : > { %625 = vmatpush.bf16.msra.mxu2 %v1614_v6  ;;  %v1620_v15 = vld [vmem:[%s2062_s1 + $0x60] sm:$0xff]  ;;  %v1611_v24 = vld [vmem:[%s2062_s1 + $0x18] sm:$0xff]  ;;  %v227_v27 = vrot.slane %v219_v21, 2  ;;  %v1840_v29 = vsel %vm228_vm1, %v217_v19, %v225_v23  ;;  %v277_v31 = vsel %vm273_vm4, %v217_v19, %v225_v23  ;;  %v1626_v37 = vld [vmem:[%s2062_s1 + $0x90] sm:$0xff] }
  0x14   : > { %639 = vmatpush.bf16.msra.mxu3 %v1622_v7  ;;  %v216_v18 = vld [vmem:[%s1812_s24] sm:$0x77]  ;;  %v1619_v25 = vld [vmem:[%s2062_s1 + $0x58] sm:$0xff]  ;;  %v1845_v32 = vsel %vm228_vm1, %v218_v20, %v226_v26  ;;  %v279_v35 = vrot.slane %v277_v31, 2  ;;  %v1634_v38 = vld [vmem:[%s2062_s1 + $0xd0] sm:$0xff]  ;;  %v280_v39 = vsel %vm273_vm4, %v218_v20, %v226_v26  ;;  %v306_v48 = vshrl.u32 %v1840_v29, 16 }
  0x15   : > { %491 = vmatpush.bf16.msra.mxu0 %v1629_v8  ;;  %v224_v22 = vrot.slane %v216_v18, 2  ;;  %v1848_v33 = vsel %vm228_vm1, %v219_v21, %v227_v27  ;;  %v283_v40 = vsel %vm273_vm4, %v219_v21, %v227_v27  ;;  %v1610_v43 = vld [vmem:[%s2062_s1 + $0x10] sm:$0xff]  ;;  %v282_v45 = vrot.slane %v280_v39, 2  ;;  %vm1876_vm7 = vmor %vm1852_vm6, %vm289_vm3  ;;  %v1625_v57 = vld [vmem:[%s2062_s1 + $0x88] sm:$0xff] }
  0x16   : > { %505 = vmatpush.bf16.msra.mxu1 %v1637_v9  ;;  %v1618_v44 = vld [vmem:[%s2062_s1 + $0x50] sm:$0xff]  ;;  %v285_v46 = vrot.slane %v283_v40, 2  ;;  %v309_v52 = vshll.u32 %v1840_v29, 16  ;;  %v315_v53 = vshll.u32 %v279_v35, 16  ;;  %v308_v54 = vrot.slane %v306_v48, 6  ;;  %v1633_v58 = vld [vmem:[%s2062_s1 + $0xc8] sm:$0xff]  ;;  %vm1898_vm8 = vmor %vm1876_vm7, %vm291_vm5 }
  0x17   : > { %626 = vmatpush.bf16.msra.mxu2 %v1613_v10  ;;  %v1837_v28 = vsel %vm228_vm1, %v216_v18, %v224_v22  ;;  %v274_v30 = vsel %vm273_vm4, %v216_v18, %v224_v22  ;;  %v319_v55 = vshrl.u32 %v1845_v32, 16  ;;  %v322_v56 = vshll.u32 %v1845_v32, 16  ;;  %v1609_v63 = vld [vmem:[%s2062_s1 + $0x8] sm:$0xff]  ;;  %v1608_v18 = vld [vmem:[%s2062_s1] sm:$0xff]  ;;  %v1647_v23 = vld [vmem:[%s2062_s1 + $0x138] sm:$0xff] }
  0x18   : > { %640 = vmatpush.bf16.msra.mxu3 %v1621_v11  ;;  %v276_v34 = vrot.slane %v274_v30, 2  ;;  %v293_v41 = vshrl.u32 %v1837_v28, 16  ;;  %v296_v42 = vshll.u32 %v1837_v28, 16  ;;  %v311_v61 = vrot.slane %v309_v52, 7  ;;  %v1617_v0 = vld [vmem:[%s2062_s1 + $0x48] sm:$0xff]  ;;  %v1616_v19 = vld [vmem:[%s2062_s1 + $0x40] sm:$0xff] }
  0x19   : > { %492 = vmatpush.bf16.msra.mxu0 %v1628_v12  ;;  %v328_v62 = vshll.u32 %v282_v45, 16  ;;  %v321_v2 = vrot.slane %v319_v55, 6  ;;  %v324_v3 = vrot.slane %v322_v56, 7  ;;  %v332_v4 = vshrl.u32 %v1848_v33, 16  ;;  %v1663_v26 = vld [vmem:[%s2062_s1 + $0x1b8] sm:$0xff]  ;;  %v1646_v35 = vld [vmem:[%s2062_s1 + $0x130] sm:$0xff] }
  0x1a   : > { %506 = vmatpush.bf16.msra.mxu1 %v1636_v13  ;;  %v302_v47 = vshll.u32 %v276_v34, 16  ;;  %v295_v50 = vrot.slane %v293_v41, 6  ;;  %v298_v51 = vrot.slane %v296_v42, 7  ;;  %v335_v5 = vshll.u32 %v1848_v33, 16  ;;  %v1671_v27 = vld [vmem:[%s2062_s1 + $0x1f8] sm:$0xff]  ;;  %v1654_v36 = vld [vmem:[%s2062_s1 + $0x170] sm:$0xff] }
  0x1b   : > { %627 = vmatpush.bf16.msra.mxu2 %v1612_v14  ;;  %v312_v7 = vor.u32 %v311_v61, %v308_v54  ;;  %v317_v8 = vrot.slane %v315_v53, 7  ;;  %v341_v9 = vshll.u32 %v285_v46, 16  ;;  %v325_v10 = vor.u32 %v324_v3, %v321_v2  ;;  %v1624_v14 = vld [vmem:[%s2062_s1 + $0x80] sm:$0xff]  ;;  %v1409_v39 = vld [vmem:[%s1812_s24 + $0x8] sm:$0x77] }
  0x1c   : > { %641 = vmatpush.bf16.msra.mxu3 %v1620_v15  ;;  %v299_v59 = vor.u32 %v298_v51, %v295_v50  ;;  %v304_v60 = vrot.slane %v302_v47, 7  ;;  %v330_v11 = vrot.slane %v328_v62, 7  ;;  %v334_v12 = vrot.slane %v332_v4, 6  ;;  %v1632_v15 = vld [vmem:[%s2062_s1 + $0xc0] sm:$0xff]  ;;  %v1410_v40 = vld [vmem:[%s1812_s24 + $0x10] sm:$0x77] }
  0x1d   : > { %493 = vmatpush.bf16.msra.mxu0 %v1627_v16  ;;  %v337_v13 = vrot.slane %v335_v5, 7  ;;  %v326_v20 = vrot.slane %v325_v10, 2  ;;  %v343_v22 = vrot.slane %v341_v9, 7  ;;  %v1411_v41 = vld [vmem:[%s1812_s24 + $0x18] sm:$0x77]  ;;  %v664_v45 = vrot.slane %v1409_v39, 2 }
  0x1e   : > { %507 = vmatpush.bf16.msra.mxu1 %v1635_v17  ;;  %v300_v6 = vrot.slane %v299_v59, 2  ;;  %v313_v17 = vrot.slane %v312_v7, 2  ;;  %v1412_v42 = vld [vmem:[%s1812_s24 + $0x20] sm:$0x77]  ;;  %v1661_v46 = vld [vmem:[%s2062_s1 + $0x1a8] sm:$0xff]  ;;  %v665_v48 = vrot.slane %v1410_v40, 2 }
  0x1f   : > { %628 = vmatpush.bf16.msra.mxu2 %v1611_v24  ;;  %v338_v21 = vor.u32 %v337_v13, %v334_v12  ;;  %v1655_v24 = vld [vmem:[%s2062_s1 + $0x178] sm:$0xff]  ;;  %v331_v30 = vsel %vm1898_vm8, %v326_v20, %v330_v11  ;;  %v1669_v47 = vld [vmem:[%s2062_s1 + $0x1e8] sm:$0xff]  ;;  %v666_v49 = vrot.slane %v1411_v41, 2  ;;  %v667_v50 = vrot.slane %v1412_v42, 2  ;;  %v1644_v53 = vld [vmem:[%s2062_s1 + $0x120] sm:$0xff] }
  0x20   : > { %642 = vmatpush.bf16.msra.mxu3 %v1619_v25  ;;  %v305_v16 = vsel %vm1898_vm8, %v300_v6, %v304_v60  ;;  %v318_v25 = vsel %vm1898_vm8, %v313_v17, %v317_v8  ;;  %385 = vst [vmem:[#allocation1 + $0x2] ss:$4 sm:$0xff] %v331_v30  ;;  %v1652_v54 = vld [vmem:[%s2062_s1 + $0x160] sm:$0xff]  ;;  %v670_v55 = vsel %vm228_vm1, %v1409_v39, %v664_v45  ;;  %v1659_v4 = vld [vmem:[%s2062_s1 + $0x198] sm:$0xff]  ;;  %v1658_v20 = vld [vmem:[%s2062_s1 + $0x190] sm:$0xff] }
  0x21   : > { %494 = vmatpush.bf16.msra.mxu0 %v1626_v37  ;;  %379 = vst [vmem:[#allocation1] ss:$4 sm:$0xff] %v305_v16  ;;  %v339_v31 = vrot.slane %v338_v21, 2  ;;  %v1662_v37 = vld [vmem:[%s2062_s1 + $0x1b0] sm:$0xff]  ;;  %v1668_v56 = vld [vmem:[%s2062_s1 + $0x1e0] sm:$0xff]  ;;  %v850_v59 = vsel %vm273_vm4, %v1409_v39, %v664_v45  ;;  %v853_v60 = vsel %vm273_vm4, %v1410_v40, %v665_v48  ;;  %v862_v61 = vshrl.u32 %v670_v55, 16 }
  0x22   : > { %508 = vmatpush.bf16.msra.mxu1 %v1634_v38  ;;  %382 = vst [vmem:[#allocation1 + $0x1] ss:$4 sm:$0xff] %v318_v25  ;;  %v1670_v38 = vld [vmem:[%s2062_s1 + $0x1f0] sm:$0xff]  ;;  %v865_v62 = vshll.u32 %v670_v55, 16  ;;  %v1667_v5 = vld [vmem:[%s2062_s1 + $0x1d8] sm:$0xff]  ;;  %v852_v10 = vrot.slane %v850_v59, 2 }
  0x23   : > { %629 = vmatpush.bf16.msra.mxu2 %v1610_v43  ;;  %v344_v34 = vsel %vm1898_vm8, %v339_v31, %v343_v22  ;;  %v1645_v43 = vld [vmem:[%s2062_s1 + $0x128] sm:$0xff]  ;;  %v855_v11 = vrot.slane %v853_v60, 2  ;;  %v864_v12 = vrot.slane %v862_v61, 6  ;;  %v1666_v21 = vld [vmem:[%s2062_s1 + $0x1d0] sm:$0xff] }
  0x24   : > { %643 = vmatpush.bf16.msra.mxu3 %v1618_v44  ;;  %388 = vst [vmem:[#allocation1 + $0x3] ss:$4 sm:$0xff] %v344_v34  ;;  %v1653_v44 = vld [vmem:[%s2062_s1 + $0x168] sm:$0xff]  ;;  %v867_v13 = vrot.slane %v865_v62, 7  ;;  %v871_v31 = vshll.u32 %v852_v10, 16 }
  0x25   : > { %495 = vmatpush.bf16.msra.mxu0 %v1625_v57  ;;  %v673_v57 = vsel %vm228_vm1, %v1410_v40, %v665_v48  ;;  %v1641_v34 = vld [vmem:[%s2062_s1 + $0x108] sm:$0xff] }
  0x26   : > { %509 = vmatpush.bf16.msra.mxu1 %v1633_v58  ;;  %v676_v58 = vsel %vm228_vm1, %v1411_v41, %v666_v49  ;;  %v875_v2 = vshrl.u32 %v673_v57, 16  ;;  %v878_v3 = vshll.u32 %v673_v57, 16  ;;  %v868_v30 = vor.u32 %v867_v13, %v864_v12  ;;  %v1665_v39 = vld [vmem:[%s2062_s1 + $0x1c8] sm:$0xff] }
  0x27   : > { %630 = vmatpush.bf16.msra.mxu2 %v1609_v63  ;;  %v1651_v63 = vld [vmem:[%s2062_s1 + $0x158] sm:$0xff]  ;;  %v888_v6 = vshrl.u32 %v676_v58, 16  ;;  %v891_v7 = vshll.u32 %v676_v58, 16  ;;  %v873_v45 = vrot.slane %v871_v31, 7 }
  0x28   : > { %644 = vmatpush.bf16.msra.mxu3 %v1617_v0  ;;  %v856_v0 = vsel %vm273_vm4, %v1411_v41, %v666_v49 }
  0x29   : > { %496 = vmatpush.bf16.msra.mxu0 %v1624_v14  ;;  %v1642_v14 = vld [vmem:[%s2062_s1 + $0x110] sm:$0xff]  ;;  %v858_v16 = vrot.slane %v856_v0, 2  ;;  %v890_v22 = vrot.slane %v888_v6, 6 }
  0x2a   : > { %510 = vmatpush.bf16.msra.mxu1 %v1632_v15  ;;  %v1650_v15 = vld [vmem:[%s2062_s1 + $0x150] sm:$0xff] }
  0x2b   : > { %631 = vmatpush.bf16.msra.mxu2 %v1608_v18  ;;  %v389_v51 = vld.sshfl [vmem:[#allocation1] sm:$0xff pattern:$0x73625140]  ;;  %v390_v52 = vld.sshfl [vmem:[#allocation1 + $0x8] sm:$0xff pattern:$0x73625140] }
  0x2c   : > { %645 = vmatpush.bf16.msra.mxu3 %v1616_v19  ;;  %517 = vst [vmem:[#allocation1] ss:$4 sm:$0xff] %v1837_v28  ;;  %v1660_v28 = vld [vmem:[%s2062_s1 + $0x1a0] sm:$0xff]  ;;  %497 = vmatmul.bf16.vlgmr.msra.gmra.mxu0 %v389_v51  ;;  %v877_v18 = vrot.slane %v875_v2, 6  ;;  %v880_v19 = vrot.slane %v878_v3, 7  ;;  %v897_v41 = vshll.u32 %v858_v16, 16 }
  0x2d   : > { %820 = vmatpush.bf16.msrb.mxu0 %v1647_v23  ;;  %519 = vst [vmem:[#allocation1 + $0x1] ss:$4 sm:$0xff] %v1840_v29  ;;  %511 = vmatmul.bf16.vlgmr.msra.gmra.mxu1 %v390_v52  ;;  %v679_v29 = vsel %vm228_vm1, %v1412_v42, %v667_v50  ;;  %v893_v23 = vrot.slane %v891_v7, 7  ;;  %v1664_v51 = vld [vmem:[%s2062_s1 + $0x1c0] sm:$0xff] }
  0x2e   : > { %834 = vmatpush.bf16.msrb.mxu1 %v1655_v24  ;;  %521 = vst [vmem:[#allocation1 + $0x2] ss:$4 sm:$0xff] %v1845_v32  ;;  %v1643_v32 = vld [vmem:[%s2062_s1 + $0x118] sm:$0xff]  ;;  %v901_v8 = vshrl.u32 %v679_v29, 16  ;;  %v904_v9 = vshll.u32 %v679_v29, 16 }
  0x2f   : > { %1058 = vmatpush.bf16.msrb.mxu2 %v1663_v26  ;;  %523 = vst [vmem:[#allocation1 + $0x3] ss:$4 sm:$0xff] %v1848_v33  ;;  %v859_v33 = vsel %vm273_vm4, %v1412_v42, %v667_v50  ;;  %v894_v40 = vor.u32 %v893_v23, %v890_v22  ;;  %v1656_v50 = vld [vmem:[%s2062_s1 + $0x180] sm:$0xff] }
  0x30   : > { %1072 = vmatpush.bf16.msrb.mxu3 %v1671_v27  ;;  %v861_v17 = vrot.slane %v859_v33, 2  ;;  %v903_v24 = vrot.slane %v901_v8, 6  ;;  %v906_v25 = vrot.slane %v904_v9, 7 }
  0x31   : > { %821 = vmatpush.bf16.msrb.mxu0 %v1646_v35  ;;  %v1649_v35 = vld [vmem:[%s2062_s1 + $0x148] sm:$0xff]  ;;  %v895_v52 = vrot.slane %v894_v40, 2 }
  0x32   : > { %835 = vmatpush.bf16.msrb.mxu1 %v1654_v36  ;;  %v881_v36 = vor.u32 %v880_v19, %v877_v18  ;;  %v907_v42 = vor.u32 %v906_v25, %v903_v24 }
  0x33   : > { %1059 = vmatpush.bf16.msrb.mxu2 %v1662_v37  ;;  %v884_v37 = vshll.u32 %v855_v11, 16 }
  0x34   : > { %1073 = vmatpush.bf16.msrb.mxu3 %v1670_v38  ;;  %v1657_v38 = vld [vmem:[%s2062_s1 + $0x188] sm:$0xff]  ;;  %v882_v48 = vrot.slane %v881_v36, 2 }
  0x35   : > { %822 = vmatpush.bf16.msrb.mxu0 %v1645_v43  ;;  %v910_v43 = vshll.u32 %v861_v17, 16  ;;  %v886_v49 = vrot.slane %v884_v37, 7 }
  0x36   : > { %836 = vmatpush.bf16.msrb.mxu1 %v1653_v44  ;;  %v524_v26 = vld.sshfl [vmem:[#allocation1] sm:$0xff pattern:$0x73625140]  ;;  %v525_v27 = vld.sshfl [vmem:[#allocation1 + $0x8] sm:$0xff pattern:$0x73625140] }
  0x37   : > { %1060 = vmatpush.bf16.msrb.mxu2 %v1661_v46  ;;  %646 = vmatmul.bf16.vlgmr.msra.gmra.mxu3 %v525_v27  ;;  %713 = vst [vmem:[#allocation1] ss:$4 sm:$0xff] %v670_v55  ;;  %v869_v44 = vrot.slane %v868_v30, 2  ;;  %v1640_v46 = vld [vmem:[%s2062_s1 + $0x100] sm:$0xff]  ;;  %v912_v55 = vrot.slane %v910_v43, 7 }
  0x38   : > { %1074 = vmatpush.bf16.msrb.mxu3 %v1669_v47  ;;  %632 = vmatmul.bf16.vlgmr.msra.gmra.mxu2 %v524_v26  ;;  %715 = vst [vmem:[#allocation1 + $0x1] ss:$4 sm:$0xff] %v673_v57  ;;  %v1648_v47 = vld [vmem:[%s2062_s1 + $0x140] sm:$0xff] }
  0x39   : > { %823 = vmatpush.bf16.msrb.mxu0 %v1644_v53  ;;  %717 = vst [vmem:[#allocation1 + $0x2] ss:$4 sm:$0xff] %v676_v58  ;;  %v899_v53 = vrot.slane %v897_v41, 7 }
  0x3a   : > { %837 = vmatpush.bf16.msrb.mxu1 %v1652_v54  ;;  %719 = vst [vmem:[#allocation1 + $0x3] ss:$4 sm:$0xff] %v679_v29  ;;  %v908_v54 = vrot.slane %v907_v42, 2 }
  0x3b   : > { %1061 = vmatpush.bf16.msrb.mxu2 %v1660_v28  ;;  %v874_v28 = vsel %vm1898_vm8, %v869_v44, %v873_v45  ;;  %v900_v29 = vsel %vm1898_vm8, %v895_v52, %v899_v53 }
  0x3c   : > { %1075 = vmatpush.bf16.msrb.mxu3 %v1668_v56  ;;  %v887_v56 = vsel %vm1898_vm8, %v882_v48, %v886_v49  ;;  %v913_v59 = vsel %vm1898_vm8, %v908_v54, %v912_v55 }
  0x3d   : > { %824 = vmatpush.bf16.msrb.mxu0 %v1643_v32 }
  0x3e   : > { %838 = vmatpush.bf16.msrb.mxu1 %v1651_v63 }
  0x3f   : > { %1062 = vmatpush.bf16.msrb.mxu2 %v1659_v4 }
  0x40   : > { %1076 = vmatpush.bf16.msrb.mxu3 %v1667_v5 }
  0x41   : > { %825 = vmatpush.bf16.msrb.mxu0 %v1642_v14  ;;  %v720_v57 = vld.sshfl [vmem:[#allocation1] sm:$0xff pattern:$0x73625140]  ;;  %v721_v58 = vld.sshfl [vmem:[#allocation1 + $0x8] sm:$0xff pattern:$0x73625140] }
  0x42   : > { %839 = vmatpush.bf16.msrb.mxu1 %v1650_v15  ;;  %948 = vst [vmem:[#allocation1] ss:$4 sm:$0xff] %v874_v28 }
  0x43   : > { %1063 = vmatpush.bf16.msrb.mxu2 %v1658_v20  ;;  %951 = vst [vmem:[#allocation1 + $0x1] ss:$4 sm:$0xff] %v887_v56 }
  0x44   : > { %1077 = vmatpush.bf16.msrb.mxu3 %v1666_v21  ;;  %954 = vst [vmem:[#allocation1 + $0x2] ss:$4 sm:$0xff] %v900_v29 }
  0x45   : > { %826 = vmatpush.bf16.msrb.mxu0 %v1641_v34  ;;  %957 = vst [vmem:[#allocation1 + $0x3] ss:$4 sm:$0xff] %v913_v59 }
  0x46   : > { %840 = vmatpush.bf16.msrb.mxu1 %v1649_v35 }
  0x47   : > { %1064 = vmatpush.bf16.msrb.mxu2 %v1657_v38 }
  0x48   : > { %1078 = vmatpush.bf16.msrb.mxu3 %v1665_v39 }
  0x49   : > { %827 = vmatpush.bf16.msrb.mxu0 %v1640_v46 }
  0x4a   : > { %841 = vmatpush.bf16.msrb.mxu1 %v1648_v47 }
  0x4b   : > { %1065 = vmatpush.bf16.msrb.mxu2 %v1656_v50 }
  0x4c   : > { %1079 = vmatpush.bf16.msrb.mxu3 %v1664_v51  ;;  %828 = vmatmul.bf16.vlgmr.msrb.gmra.mxu0 %v720_v57  ;;  %v958_v60 = vld.sshfl [vmem:[#allocation1] sm:$0xff pattern:$0x73625140]  ;;  %v959_v61 = vld.sshfl [vmem:[#allocation1 + $0x8] sm:$0xff pattern:$0x73625140] }
  0x4d   : > { %842 = vmatmul.bf16.vlgmr.msrb.gmra.mxu1 %v721_v58 }
  0x4e   : > { %1066 = vmatmul.bf16.vlgmr.msrb.gmra.mxu2 %v958_v60 }
  0x4f   : > { %1080 = vmatmul.bf16.vlgmr.msrb.gmra.mxu3 %v959_v61 }
  0xa9   : > { %v498_v62 = vpop.f32.mrf.mxu0 }
  0xaa   : > { %v512_v32 = vpop.f32.mrf.mxu1 }
  0xab   : > { %v513_v6 = vadd.f32 %v512_v32, %v498_v62 }
  0xb1   : > { %v500_v33 = vpop.f32.mrf.mxu0 }
  0xb2   : > { %v514_v2 = vpop.f32.mrf.mxu1 }
  0xb3   : > { %v515_v7 = vadd.f32 %v514_v2, %v500_v33 }
  0xba   : > { %v647_v0 = vpop.f32.mrf.mxu3 }
  0xbb   : > { %v633_v63 = vpop.f32.mrf.mxu2 }
  0xbc   : > { %v634_v10 = vadd.f32 %v633_v63, %v513_v6 }
  0xbe   : > { %v648_v15 = vadd.f32 %v647_v0, %v634_v10 }
  0xc2   : > { %v649_v5 = vpop.f32.mrf.mxu3 }
  0xc3   : > { %v635_v1 = vpop.f32.mrf.mxu2 }
  0xc4   : > { %v636_v13 = vadd.f32 %v635_v1, %v515_v7 }
  0xc6   : > { %v650_v18 = vadd.f32 %v649_v5, %v636_v13 }
  0xc9   : > { %v829_v3 = vpop.f32.mrf.mxu0 }
  0xca   : > { %v843_v4 = vpop.f32.mrf.mxu1 }
  0xcb   : > { %v844_v14 = vadd.f32 %v843_v4, %v829_v3 }
  0xcd   : > { %v848_v19 = vadd.f32 %v844_v14, %v648_v15 }
  0xd1   : > { %v1067_v8 = vpop.f32.mrf.mxu2  ;;  %v831_v11 = vpop.f32.mrf.mxu0 }
  0xd2   : > { %v1081_v9 = vpop.f32.mrf.mxu3  ;;  %v845_v12 = vpop.f32.mrf.mxu1 }
  0xd3   : > { %v1082_v16 = vadd.f32 %v1081_v9, %v1067_v8  ;;  %v846_v17 = vadd.f32 %v845_v12, %v831_v11 }
  0xd5   : > { %v1086_v22 = vadd.f32 %v1082_v16, %v848_v19  ;;  %v849_v23 = vadd.f32 %v846_v17, %v650_v18 }
  0xd7   : > { %v1100_v26 = vmul.f32 %v1086_v22, %v1086_v22 }
  0xd9   : > { %v1069_v20 = vpop.f32.mrf.mxu2 }
  0xda   : > { %v1083_v21 = vpop.f32.mrf.mxu3 }
  0xdb   : > { %v1084_v24 = vadd.f32 %v1083_v21, %v1069_v20 }
  0xdd   : > { %v1087_v25 = vadd.f32 %v1084_v24, %v849_v23 }
  0xdf   : > { %v1675_v27 = vpack.c.bf16 %v1087_v25, %v1086_v22  ;;  %v1092_v30 = vadd.f32 %v1087_v25, %v1086_v22  ;;  %v1101_v31 = vmul.f32 %v1087_v25, %v1087_v25 }
  0xe1   : > { %1676 = vst [vmem:[%s204_s11] sm:$0xff] %v1675_v27   ;;  %v1093_v34 = vrot.slane %v1092_v30, 4  ;;  %v1102_v35 = vadd.f32 %v1101_v31, %v1100_v26 }
  0xe3   : > { %v1094_v36 = vadd.f32 %v1093_v34, %v1092_v30  ;;  %v1103_v37 = vrot.slane %v1102_v35, 4 }
  0xe5   : > { %v1095_v38 = vrot.slane %v1094_v36, 2  ;;  %v1104_v39 = vadd.f32 %v1103_v37, %v1102_v35 }
  0xe7   : > { %v1096_v40 = vadd.f32 %v1095_v38, %v1094_v36  ;;  %v1105_v41 = vrot.slane %v1104_v39, 2 }
  0xe9   : > { %v1097_v42 = vrot.slane %v1096_v40, 1  ;;  %v1106_v43 = vadd.f32 %v1105_v41, %v1104_v39 }
  0xeb   : > { %v1098_v44 = vadd.f32 %v1097_v42, %v1096_v40  ;;  %v1107_v45 = vrot.slane %v1106_v43, 1 }
  0xed   : > { %1099 = vst [vmem:[%s211_s18] sm:$0x1] %v1098_v44  ;;  %v1108_v46 = vadd.f32 %v1107_v45, %v1106_v43 }
  0xef   : > { %1109 = vst [vmem:[%s211_s18 + $0x1] sm:$0x1] %v1108_v46 }
  0xf0 PF: > { %s14_s14 = sadd.s32 1, %s1724_s14   ;;  %s2071_s12 = smov %s1720_s13 }
  0xf1   : > { %p11_p5 = scmp.ge.s32.totalorder %s14_s14, 4   ;;  %s2072_s13 = smov %s2074_s15 }
  0xf3   :  { %13 = sbr.rel (!%p11_p5) target bundleno = 2 (0x2), region = 87 }

// kernel: downsampler_px.7
= control target key start
LH: loop header
LB: loop body
LE: loop exit
PB: predicated region body
PF: predicated region fallthrough
CT: control target
= control target key end

     0   :  { %s1629_s12 = smov 0   ;;  %s1631_s13 = smov 0   ;;  %s1919_s0 = inlined_call_operand.vmem [shape: bf16[2,3,3,256], index: 0, kind: input, shape index: {}]   ;;  %s1920_s1 = inlined_call_operand.vmem [shape: bf16[4,256,128], index: 1, kind: input, shape index: {}]   ;;  %s1921_s2 = inlined_call_operand.vmem [shape: bf16[2,1,4,128], index: 2, kind: output, shape index: {0}]   ;;  %s1922_s3 = inlined_call_operand.vmem [shape: f32[2,1,2,128], index: 3, kind: output, shape index: {1}]  }
   0x1   :  { %s1633_s14 = smov 0  }
   0x2 LB: > { %s26_s15 = sadd.s32 1, %s1603_s13  ;;  %p1132_p0 = scmp.ge.s32.totalorder %s1607_s14, 1  ;;  %s1607_s14 = sphi %s1633_s14, %s14_s14   ;;  %s1603_s13 = sphi %s1631_s13, %s1927_s13   ;;  %s1599_s12 = sphi %s1629_s12, %s1926_s12  }
   0x3   : > { %p28_p1 = scmp.ge.s32.totalorder %s26_s15, 2  ;;  %p156_p2 = scmp.lt.s32.totalorder %s1607_s14, 3 }
   0x5   : > { %s1929_s15 = smov (%p28_p1, %s26_s15), 0  ;;  %p157_p3 = pnand %p1132_p0, %p156_p2 }
   0x6   : > { %p189_p4 = scmp.lt.s32.totalorder (!%p157_p3), %s1599_s12, 1 }
   0x7   : > { %160 = sbr.rel (%p157_p3) target bundleno = 231 (0xe7), region = 28 }
   0xc   : > { %v1519_v0 = vld [vmem:[%s1920_s1 + $0xb8] sm:$0xff]  ;;  %v1518_v4 = vld [vmem:[%s1920_s1 + $0xb0] sm:$0xff]  ;;  %s1931_s12 = smov (!%p189_p4, %s1599_s12), 1  ;;  %v1517_v8 = vld [vmem:[%s1920_s1 + $0xa8] sm:$0xff]  ;;  %vm222_vm0 = vcmask 1040384   ;;  %vm226_vm1 = vcmask 1042434  }
   0xd   : > { %v1527_v1 = vld [vmem:[%s1920_s1 + $0xf8] sm:$0xff]  ;;  %453 = vmatpush.bf16.msra.mxu0 %v1519_v0  ;;  %v1526_v5 = vld [vmem:[%s1920_s1 + $0xf0] sm:$0xff]  ;;  %v1525_v9 = vld [vmem:[%s1920_s1 + $0xe8] sm:$0xff]  ;;  %s1560_s9 = smul.u32 12, %s1931_s12  ;;  %vm230_vm2 = vcmask 1041408   ;;  %vm271_vm3 = vcmask 1041409  }
   0xe   : > { %v1503_v2 = vld [vmem:[%s1920_s1 + $0x38] sm:$0xff]  ;;  %466 = vmatpush.bf16.msra.mxu1 %v1527_v1  ;;  %v1502_v6 = vld [vmem:[%s1920_s1 + $0x30] sm:$0xff]  ;;  %v1501_v10 = vld [vmem:[%s1920_s1 + $0x28] sm:$0xff]  ;;  %vm273_vm4 = vcmask 1043459   ;;  %vm275_vm5 = vcmask 1042433   ;;  %s1134_s7 = sshll.u32 %s1931_s12, 1 }
   0xf   : > { %v1511_v3 = vld [vmem:[%s1920_s1 + $0x78] sm:$0xff]  ;;  %582 = vmatpush.bf16.msra.mxu2 %v1503_v2  ;;  %v1510_v7 = vld [vmem:[%s1920_s1 + $0x70] sm:$0xff]  ;;  %v1509_v11 = vld [vmem:[%s1920_s1 + $0x68] sm:$0xff]  ;;  %s1695_s24 = scalar_lea.vmem %s1919_s0, %s1560_s9  ;;  %vm284_vm6 = vsmask.f32 256  ;;  %s200_s10 = scalar_lea.vmem %s1921_s2, %s1134_s7 }
  0x10   : > { %595 = vmatpush.bf16.msra.mxu3 %v1511_v3  ;;  %v1516_v12 = vld [vmem:[%s1920_s1 + $0xa0] sm:$0xff]  ;;  %vm285_vm7 = vsmask.f32 1284  ;;  %v1515_v16 = vld [vmem:[%s1920_s1 + $0x98] sm:$0xff]  ;;  %vm287_vm8 = vsmask.f32 2312  ;;  %s207_s16 = scalar_lea.vmem %s1922_s3, %s1134_s7 }
  0x11   : > { %454 = vmatpush.bf16.msra.mxu0 %v1518_v4  ;;  %v1524_v13 = vld [vmem:[%s1920_s1 + $0xe0] sm:$0xff]  ;;  %v1523_v17 = vld [vmem:[%s1920_s1 + $0xd8] sm:$0xff]  ;;  %vm289_vm9 = vsmask.f32 3340  ;;  %vm291_vm10 = vsmask.f32 4368  ;;  %vm286_vm12 = vmor %vm284_vm6, %vm285_vm7 }
  0x12   : > { %467 = vmatpush.bf16.msra.mxu1 %v1526_v5  ;;  %v1500_v14 = vld [vmem:[%s1920_s1 + $0x20] sm:$0xff]  ;;  %v1499_v20 = vld [vmem:[%s1920_s1 + $0x18] sm:$0xff]  ;;  %vm288_vm13 = vmor %vm286_vm12, %vm287_vm8  ;;  %vm295_vm14 = vsmask.f32 6424  ;;  %vm297_vm15 = vsmask.f32 7452 }
  0x13   : > { %583 = vmatpush.bf16.msra.mxu2 %v1502_v6  ;;  %v1508_v15 = vld [vmem:[%s1920_s1 + $0x60] sm:$0xff]  ;;  %v1507_v21 = vld [vmem:[%s1920_s1 + $0x58] sm:$0xff]  ;;  %vm290_vm11 = vmor %vm288_vm13, %vm289_vm9  ;;  %vm1923_vm7 = vsmask.f32 5396 }
  0x14   : > { %596 = vmatpush.bf16.msra.mxu3 %v1510_v7  ;;  %v212_v18 = vld [vmem:[%s1695_s24] sm:$0xf]  ;;  %v213_v19 = vld [vmem:[%s1695_s24 + $0x4] sm:$0xf]  ;;  %vm292_vm6 = vmor %vm290_vm11, %vm291_vm10 }
  0x15   : > { %455 = vmatpush.bf16.msra.mxu0 %v1517_v8  ;;  %v216_v22 = vrot.slane %v212_v18, 1  ;;  %v217_v23 = vrot.slane %v212_v18, 2  ;;  %v218_v24 = vrot.slane %v212_v18, 3  ;;  %v219_v25 = vrot.slane %v213_v19, 1  ;;  %v1514_v36 = vld [vmem:[%s1920_s1 + $0x90] sm:$0xff]  ;;  %vm294_vm8 = vmor %vm292_vm6, %vm1923_vm7  ;;  %v1513_v50 = vld [vmem:[%s1920_s1 + $0x88] sm:$0xff] }
  0x16   : > { %468 = vmatpush.bf16.msra.mxu1 %v1525_v9  ;;  %v220_v26 = vrot.slane %v213_v19, 2  ;;  %v221_v27 = vrot.slane %v213_v19, 3  ;;  %v1522_v37 = vld [vmem:[%s1920_s1 + $0xd0] sm:$0xff]  ;;  %vm296_vm9 = vmor %vm294_vm8, %vm295_vm14  ;;  %v1521_v51 = vld [vmem:[%s1920_s1 + $0xc8] sm:$0xff] }
  0x17   : > { %584 = vmatpush.bf16.msra.mxu2 %v1501_v10  ;;  %v225_v28 = vsel %vm222_vm0, %v212_v18, %v216_v22  ;;  %v229_v29 = vsel %vm226_vm1, %v217_v23, %v218_v24  ;;  %v234_v30 = vsel %vm222_vm0, %v213_v19, %v219_v25  ;;  %v272_v31 = vsel %vm271_vm3, %v212_v18, %v216_v22  ;;  %v1498_v41 = vld [vmem:[%s1920_s1 + $0x10] sm:$0xff]  ;;  %vm1754_vm10 = vmor %vm296_vm9, %vm297_vm15  ;;  %v1497_v53 = vld [vmem:[%s1920_s1 + $0x8] sm:$0xff] }
  0x18   : > { %597 = vmatpush.bf16.msra.mxu3 %v1509_v11  ;;  %v1726_v32 = vsel %vm230_vm2, %v225_v28, %v229_v29  ;;  %v237_v33 = vsel %vm226_vm1, %v220_v26, %v221_v27  ;;  %v274_v34 = vsel %vm273_vm4, %v217_v23, %v218_v24  ;;  %v279_v35 = vsel %vm271_vm3, %v213_v19, %v219_v25  ;;  %v1506_v42 = vld [vmem:[%s1920_s1 + $0x50] sm:$0xff]  ;;  %v1505_v54 = vld [vmem:[%s1920_s1 + $0x48] sm:$0xff]  ;;  %v1512_v57 = vld [vmem:[%s1920_s1 + $0x80] sm:$0xff] }
  0x19   : > { %456 = vmatpush.bf16.msra.mxu0 %v1516_v12  ;;  %v1739_v38 = vsel %vm230_vm2, %v234_v30, %v237_v33  ;;  %v276_v39 = vsel %vm275_vm5, %v272_v31, %v274_v34  ;;  %v280_v40 = vsel %vm273_vm4, %v220_v26, %v221_v27  ;;  %v299_v45 = vshrl.u32 %v1726_v32, 16  ;;  %v1520_v58 = vld [vmem:[%s1920_s1 + $0xc0] sm:$0xff]  ;;  %v1535_v61 = vld [vmem:[%s1920_s1 + $0x138] sm:$0xff]  ;;  %v1299_v2 = vld [vmem:[%s1695_s24 + $0x8] sm:$0xf] }
  0x1a   : > { %469 = vmatpush.bf16.msra.mxu1 %v1524_v13  ;;  %v278_v43 = vrot.slane %v276_v39, 1  ;;  %v281_v44 = vsel %vm275_vm5, %v279_v35, %v280_v40  ;;  %v307_v48 = vshrl.u32 %v1739_v38, 16  ;;  %v1496_v59 = vld [vmem:[%s1920_s1] sm:$0xff]  ;;  %v1543_v62 = vld [vmem:[%s1920_s1 + $0x178] sm:$0xff]  ;;  %v1534_v3 = vld [vmem:[%s1920_s1 + $0x130] sm:$0xff]  ;;  %v619_v12 = vrot.slane %v1299_v2, 1 }
  0x1b   : > { %585 = vmatpush.bf16.msra.mxu2 %v1500_v14  ;;  %v283_v46 = vrot.slane %v281_v44, 1  ;;  %v1504_v60 = vld [vmem:[%s1920_s1 + $0x40] sm:$0xff]  ;;  %v1551_v63 = vld [vmem:[%s1920_s1 + $0x1b8] sm:$0xff]  ;;  %v1542_v4 = vld [vmem:[%s1920_s1 + $0x170] sm:$0xff]  ;;  %v620_v13 = vrot.slane %v1299_v2, 2  ;;  %v621_v14 = vrot.slane %v1299_v2, 3 }
  0x1c   : > { %598 = vmatpush.bf16.msra.mxu3 %v1508_v15  ;;  %v304_v49 = vshll.u32 %v278_v43, 16  ;;  %v1559_v0 = vld [vmem:[%s1920_s1 + $0x1f8] sm:$0xff]  ;;  %v1298_v1 = vld [vmem:[%s1695_s24 + $0x4] sm:$0xf]  ;;  %v1550_v5 = vld [vmem:[%s1920_s1 + $0x1b0] sm:$0xff]  ;;  %v631_v23 = vsel %vm222_vm0, %v1299_v2, %v619_v12 }
  0x1d   : > { %457 = vmatpush.bf16.msra.mxu0 %v1515_v16  ;;  %v312_v52 = vshll.u32 %v283_v46, 16  ;;  %v616_v8 = vrot.slane %v1298_v1, 1  ;;  %v617_v9 = vrot.slane %v1298_v1, 2  ;;  %v618_v10 = vrot.slane %v1298_v1, 3  ;;  %v1558_v11 = vld [vmem:[%s1920_s1 + $0x1f0] sm:$0xff]  ;;  %v1541_v22 = vld [vmem:[%s1920_s1 + $0x168] sm:$0xff] }
  0x1e   : > { %470 = vmatpush.bf16.msra.mxu1 %v1523_v17  ;;  %v306_v55 = vsel %vm1754_vm10, %v299_v45, %v304_v49  ;;  %v804_v17 = vsel %vm271_vm3, %v1299_v2, %v619_v12  ;;  %v805_v18 = vsel %vm273_vm4, %v620_v13, %v621_v14  ;;  %v634_v24 = vsel %vm226_vm1, %v620_v13, %v621_v14  ;;  %v1549_v26 = vld [vmem:[%s1920_s1 + $0x1a8] sm:$0xff]  ;;  %v1540_v33 = vld [vmem:[%s1920_s1 + $0x160] sm:$0xff]  ;;  %v1547_v45 = vld [vmem:[%s1920_s1 + $0x198] sm:$0xff] }
  0x1f   : > { %586 = vmatpush.bf16.msra.mxu2 %v1499_v20  ;;  %v314_v56 = vsel %vm1754_vm10, %v307_v48, %v312_v52  ;;  %349 = vst [vmem:[#allocation1] ss:$9 sm:$0xff] %v306_v55  ;;  %v799_v15 = vsel %vm271_vm3, %v1298_v1, %v616_v8  ;;  %v800_v16 = vsel %vm273_vm4, %v617_v9, %v618_v10  ;;  %v1557_v27 = vld [vmem:[%s1920_s1 + $0x1e8] sm:$0xff]  ;;  %v1548_v34 = vld [vmem:[%s1920_s1 + $0x1a0] sm:$0xff]  ;;  %v1555_v46 = vld [vmem:[%s1920_s1 + $0x1d8] sm:$0xff] }
  0x20   : > { %599 = vmatpush.bf16.msra.mxu3 %v1507_v21  ;;  %352 = vst [vmem:[#allocation1 + $0x1] ss:$9 sm:$0xff] %v314_v56  ;;  %v624_v19 = vsel %vm222_vm0, %v1298_v1, %v616_v8  ;;  %v627_v20 = vsel %vm226_vm1, %v617_v9, %v618_v10  ;;  %v1533_v21 = vld [vmem:[%s1920_s1 + $0x128] sm:$0xff]  ;;  %v801_v25 = vsel %vm275_vm5, %v799_v15, %v800_v16  ;;  %v1530_v49 = vld [vmem:[%s1920_s1 + $0x110] sm:$0xff]  ;;  %vm992_vm0 = vcmask 1043456  }
  0x21   : > { %458 = vmatpush.bf16.msra.mxu0 %v1514_v36  ;;  %v806_v28 = vsel %vm275_vm5, %v804_v17, %v805_v18  ;;  %v628_v29 = vsel %vm230_vm2, %v624_v19, %v627_v20  ;;  %v635_v30 = vsel %vm230_vm2, %v631_v23, %v634_v24  ;;  %v803_v31 = vrot.slane %v801_v25, 1  ;;  %v1546_v52 = vld [vmem:[%s1920_s1 + $0x190] sm:$0xff]  ;;  %v1529_v47 = vld [vmem:[%s1920_s1 + $0x108] sm:$0xff] }
  0x22   : > { %471 = vmatpush.bf16.msra.mxu1 %v1522_v37  ;;  %v808_v37 = vrot.slane %v806_v28, 1  ;;  %v809_v39 = vshrl.u32 %v628_v29, 16  ;;  %v817_v43 = vshrl.u32 %v635_v30, 16  ;;  %v1537_v56 = vld [vmem:[%s1920_s1 + $0x148] sm:$0xff] }
  0x23   : > { %587 = vmatpush.bf16.msra.mxu2 %v1498_v41  ;;  %v814_v40 = vshll.u32 %v803_v31, 16  ;;  %v1531_v41 = vld [vmem:[%s1920_s1 + $0x118] sm:$0xff] }
  0x24   : > { %600 = vmatpush.bf16.msra.mxu3 %v1506_v42  ;;  %v1539_v42 = vld [vmem:[%s1920_s1 + $0x158] sm:$0xff]  ;;  %v822_v44 = vshll.u32 %v808_v37, 16 }
  0x25   : > { %459 = vmatpush.bf16.msra.mxu0 %v1513_v50  ;;  %v816_v48 = vsel %vm1754_vm10, %v809_v39, %v814_v40  ;;  %v1538_v50 = vld [vmem:[%s1920_s1 + $0x150] sm:$0xff] }
  0x26   : > { %472 = vmatpush.bf16.msra.mxu1 %v1521_v51  ;;  %v824_v51 = vsel %vm1754_vm10, %v817_v43, %v822_v44 }
  0x27   : > { %588 = vmatpush.bf16.msra.mxu2 %v1497_v53  ;;  %v353_v6 = vld [vmem:[#allocation1] sm:$0xff]  ;;  %v354_v7 = vld [vmem:[#allocation1 + $0x9] sm:$0xff] }
  0x28   : > { %601 = vmatpush.bf16.msra.mxu3 %v1505_v54  ;;  %479 = vst [vmem:[#allocation1] ss:$9 sm:$0xff] %v1726_v32  ;;  %v1532_v32 = vld [vmem:[%s1920_s1 + $0x120] sm:$0xff]  ;;  %v1554_v53 = vld [vmem:[%s1920_s1 + $0x1d0] sm:$0xff] }
  0x29   : > { %460 = vmatpush.bf16.msra.mxu0 %v1512_v57  ;;  %481 = vst [vmem:[#allocation1 + $0x1] ss:$9 sm:$0xff] %v1739_v38  ;;  %v1556_v38 = vld [vmem:[%s1920_s1 + $0x1e0] sm:$0xff]  ;;  %v1545_v57 = vld [vmem:[%s1920_s1 + $0x188] sm:$0xff] }
  0x2a   : > { %473 = vmatpush.bf16.msra.mxu1 %v1520_v58  ;;  %v1553_v58 = vld [vmem:[%s1920_s1 + $0x1c8] sm:$0xff] }
  0x2b   : > { %589 = vmatpush.bf16.msra.mxu2 %v1496_v59  ;;  %v1528_v59 = vld [vmem:[%s1920_s1 + $0x100] sm:$0xff] }
  0x2c   : > { %602 = vmatpush.bf16.msra.mxu3 %v1504_v60  ;;  %461 = vmatmul.bf16.vlgmr.msra.gmra.mxu0 %v353_v6  ;;  %v1536_v60 = vld [vmem:[%s1920_s1 + $0x140] sm:$0xff] }
  0x2d   : > { %772 = vmatpush.bf16.msrb.mxu0 %v1535_v61  ;;  %474 = vmatmul.bf16.vlgmr.msra.gmra.mxu1 %v354_v7  ;;  %v1544_v61 = vld [vmem:[%s1920_s1 + $0x180] sm:$0xff] }
  0x2e   : > { %785 = vmatpush.bf16.msrb.mxu1 %v1543_v62  ;;  %v1552_v62 = vld [vmem:[%s1920_s1 + $0x1c0] sm:$0xff] }
  0x2f   : > { %963 = vmatpush.bf16.msrb.mxu2 %v1551_v63 }
  0x30   : > { %976 = vmatpush.bf16.msrb.mxu3 %v1559_v0  ;;  %v482_v35 = vld [vmem:[#allocation1] sm:$0xff]  ;;  %v483_v36 = vld [vmem:[#allocation1 + $0x9] sm:$0xff] }
  0x31   : > { %773 = vmatpush.bf16.msrb.mxu0 %v1534_v3  ;;  %590 = vmatmul.bf16.vlgmr.msra.gmra.mxu2 %v482_v35  ;;  %669 = vst [vmem:[#allocation1] ss:$9 sm:$0xff] %v628_v29 }
  0x32   : > { %786 = vmatpush.bf16.msrb.mxu1 %v1542_v4  ;;  %603 = vmatmul.bf16.vlgmr.msra.gmra.mxu3 %v483_v36  ;;  %671 = vst [vmem:[#allocation1 + $0x1] ss:$9 sm:$0xff] %v635_v30 }
  0x33   : > { %964 = vmatpush.bf16.msrb.mxu2 %v1550_v5 }
  0x34   : > { %977 = vmatpush.bf16.msrb.mxu3 %v1558_v11 }
  0x35   : > { %774 = vmatpush.bf16.msrb.mxu0 %v1533_v21 }
  0x36   : > { %787 = vmatpush.bf16.msrb.mxu1 %v1541_v22 }
  0x37   : > { %965 = vmatpush.bf16.msrb.mxu2 %v1549_v26 }
  0x38   : > { %978 = vmatpush.bf16.msrb.mxu3 %v1557_v27 }
  0x39   : > { %775 = vmatpush.bf16.msrb.mxu0 %v1532_v32  ;;  %v672_v54 = vld [vmem:[#allocation1] sm:$0xff]  ;;  %v673_v55 = vld [vmem:[#allocation1 + $0x9] sm:$0xff] }
  0x3a   : > { %788 = vmatpush.bf16.msrb.mxu1 %v1540_v33  ;;  %859 = vst [vmem:[#allocation1] ss:$9 sm:$0xff] %v816_v48 }
  0x3b   : > { %966 = vmatpush.bf16.msrb.mxu2 %v1548_v34  ;;  %862 = vst [vmem:[#allocation1 + $0x1] ss:$9 sm:$0xff] %v824_v51 }
  0x3c   : > { %979 = vmatpush.bf16.msrb.mxu3 %v1556_v38 }
  0x3d   : > { %776 = vmatpush.bf16.msrb.mxu0 %v1531_v41 }
  0x3e   : > { %789 = vmatpush.bf16.msrb.mxu1 %v1539_v42 }
  0x3f   : > { %967 = vmatpush.bf16.msrb.mxu2 %v1547_v45 }
  0x40   : > { %980 = vmatpush.bf16.msrb.mxu3 %v1555_v46 }
  0x41   : > { %777 = vmatpush.bf16.msrb.mxu0 %v1530_v49 }
  0x42   : > { %790 = vmatpush.bf16.msrb.mxu1 %v1538_v50  ;;  %v863_v63 = vld [vmem:[#allocation1] sm:$0xff]  ;;  %v864_v0 = vld [vmem:[#allocation1 + $0x9] sm:$0xff] }
  0x43   : > { %968 = vmatpush.bf16.msrb.mxu2 %v1546_v52 }
  0x44   : > { %981 = vmatpush.bf16.msrb.mxu3 %v1554_v53 }
  0x45   : > { %778 = vmatpush.bf16.msrb.mxu0 %v1529_v47 }
  0x46   : > { %791 = vmatpush.bf16.msrb.mxu1 %v1537_v56 }
  0x47   : > { %969 = vmatpush.bf16.msrb.mxu2 %v1545_v57 }
  0x48   : > { %982 = vmatpush.bf16.msrb.mxu3 %v1553_v58 }
  0x49   : > { %779 = vmatpush.bf16.msrb.mxu0 %v1528_v59 }
  0x4a   : > { %792 = vmatpush.bf16.msrb.mxu1 %v1536_v60 }
  0x4b   : > { %970 = vmatpush.bf16.msrb.mxu2 %v1544_v61 }
  0x4c   : > { %983 = vmatpush.bf16.msrb.mxu3 %v1552_v62  ;;  %780 = vmatmul.bf16.vlgmr.msrb.gmra.mxu0 %v672_v54 }
  0x4d   : > { %793 = vmatmul.bf16.vlgmr.msrb.gmra.mxu1 %v673_v55 }
  0x4e   : > { %971 = vmatmul.bf16.vlgmr.msrb.gmra.mxu2 %v863_v63 }
  0x4f   : > { %984 = vmatmul.bf16.vlgmr.msrb.gmra.mxu3 %v864_v0 }
  0xa9   : > { %v462_v1 = vpop.f32.mrf.mxu0 }
  0xaa   : > { %v475_v2 = vpop.f32.mrf.mxu1 }
  0xab   : > { %v476_v9 = vadd.f32 %v475_v2, %v462_v1 }
  0xb1   : > { %v464_v3 = vpop.f32.mrf.mxu0 }
  0xb2   : > { %v477_v4 = vpop.f32.mrf.mxu1 }
  0xb4   : > { %v591_v5 = vpop.f32.mrf.mxu2 }
  0xb5   : > { %v604_v6 = vpop.f32.mrf.mxu3  ;;  %v592_v12 = vadd.f32 %v591_v5, %v476_v9 }
  0xb7   : > { %v605_v14 = vadd.f32 %v604_v6, %v592_v12 }
  0xbc   : > { %v593_v7 = vpop.f32.mrf.mxu2 }
  0xbd   : > { %v606_v8 = vpop.f32.mrf.mxu3 }
  0xc9   : > { %v781_v10 = vpop.f32.mrf.mxu0 }
  0xca   : > { %v794_v11 = vpop.f32.mrf.mxu1 }
  0xcb   : > { %v795_v13 = vadd.f32 %v794_v11, %v781_v10 }
  0xcd   : > { %v798_v17 = vadd.f32 %v795_v13, %v605_v14 }
  0xd1   : > { %v972_v15 = vpop.f32.mrf.mxu2  ;;  %v783_v19 = vpop.f32.mrf.mxu0 }
  0xd2   : > { %v985_v16 = vpop.f32.mrf.mxu3  ;;  %v796_v20 = vpop.f32.mrf.mxu1 }
  0xd3   : > { %v986_v18 = vadd.f32 %v985_v16, %v972_v15 }
  0xd5   : > { %v989_v21 = vadd.f32 %v986_v18, %v798_v17 }
  0xd7   : > { %v990_v22 = vpack.c.bf16 %v989_v21, %v989_v21  ;;  %v993_v23 = vsel %vm992_vm0, %v989_v21, 0.0  ;;  %v1001_v24 = vmul.f32 %v989_v21, %v989_v21 }
  0xd8   : > { %v994_v25 = vrot.slane %v993_v23, 4 }
  0xd9   : > { %991 = vst [vmem:[%s200_s10] sm:$0x3] %v990_v22  ;;  %v1002_v26 = vsel %vm992_vm0, %v1001_v24, 0.0  ;;  %v974_v29 = vpop.f32.mrf.mxu2 }
  0xda   : > { %v995_v27 = vadd.f32 %v994_v25, %v993_v23  ;;  %v1003_v28 = vrot.slane %v1002_v26, 4  ;;  %v987_v30 = vpop.f32.mrf.mxu3 }
  0xdc   : > { %v996_v31 = vrot.slane %v995_v27, 2  ;;  %v1004_v32 = vadd.f32 %v1003_v28, %v1002_v26 }
  0xde   : > { %v997_v33 = vadd.f32 %v996_v31, %v995_v27  ;;  %v1005_v34 = vrot.slane %v1004_v32, 2 }
  0xe0   : > { %v998_v35 = vrot.slane %v997_v33, 1  ;;  %v1006_v36 = vadd.f32 %v1005_v34, %v1004_v32 }
  0xe2   : > { %v999_v37 = vadd.f32 %v998_v35, %v997_v33  ;;  %v1007_v38 = vrot.slane %v1006_v36, 1 }
  0xe4   : > { %1000 = vst [vmem:[%s207_s16] sm:$0x1] %v999_v37  ;;  %v1008_v39 = vadd.f32 %v1007_v38, %v1006_v36 }
  0xe6   : > { %1009 = vst [vmem:[%s207_s16 + $0x1] sm:$0x1] %v1008_v39 }
  0xe7 PF: > { %s14_s14 = sadd.s32 1, %s1607_s14   ;;  %s1926_s12 = smov %s1603_s13 }
  0xe8   : > { %p11_p5 = scmp.ge.s32.totalorder %s14_s14, 4   ;;  %s1927_s13 = smov %s1929_s15 }
  0xea   :  { %13 = sbr.rel (!%p11_p5) target bundleno = 2 (0x2), region = 79 }

// kernel: downsampler_px.9
= control target key start
LH: loop header
LB: loop body
LE: loop exit
PB: predicated region body
PF: predicated region fallthrough
CT: control target
= control target key end

     0   :  { %s106_s0 = inlined_call_operand.vmem [shape: bf16[2,128], index: 0, kind: input, shape index: {}]   ;;  %s107_s1 = inlined_call_operand.vmem [shape: f32[1,128], index: 1, kind: input, shape index: {}]   ;;  %s108_s2 = inlined_call_operand.vmem [shape: f32[1,128], index: 2, kind: input, shape index: {}]   ;;  %s109_s3 = inlined_call_operand.hbm [shape: f32[2,128], index: 3, kind: output, shape index: {}]  }
   0x1   :  { %v15_v0 = vld [vmem:[%s106_s0] sm:$0x1] }
   0x2   :  { %v45_v1 = vld [vmem:[%s107_s1] ss:$0 sm:$0xff]  ;;  %v16_v2 = vunpack.c.l.bf16 %v15_v0 }
   0x3   :  { %v46_v3 = vld [vmem:[%s108_s2] ss:$0 sm:$0xff] }
   0x4   :  { %8 = vsyncpa [#allocation3], 0  ;;  %s35_s20 = sshll.u32 %s109_s3, 4  ;;  %v21_v4 = vmul.f32 %v45_v1, %v16_v2  ;;  %s73_s21 = smov [#allocation2]   ;;  %s36_s20 = int_to_ptr.hbm [resolvable:$true] %s35_s20 }
   0x5   :  { %s33_s22 = sshll.u32 %s73_s21, 4  ;;  %s34_s22 = int_to_ptr.vmem [resolvable:$true] %s33_s22 }
   0x6   :  { %v26_v5 = vadd.f32 %v46_v3, %v21_v4 }
   0x8   :  { %27 = vst [vmem:[#allocation2] sm:$0x3] %v26_v5 }
   0x9   :  { %38 = dma.vmem_to_hbm [thread:$0]  %s34_s22, 32, %s36_s20, [#allocation3]  }
   0xa   :  { %71 = dma.done.wait [#allocation3], 32  }
   0xb   :  { %72 = vsyncadd [#allocation3], 4294967264 }
   0xc   :  { %43 = vsyncpa [#allocation3], 1 }

// kernel: downsampler_px.8
= control target key start
LH: loop header
LB: loop body
LE: loop exit
PB: predicated region body
PF: predicated region fallthrough
CT: control target
= control target key end

     0   :  { %s1478_s12 = smov 0   ;;  %s1480_s13 = smov 0   ;;  %s1715_s0 = inlined_call_operand.vmem [shape: bf16[2,2,2,256], index: 0, kind: input, shape index: {}]   ;;  %s1716_s1 = inlined_call_operand.vmem [shape: bf16[4,256,128], index: 1, kind: input, shape index: {}]   ;;  %s1717_s2 = inlined_call_operand.vmem [shape: bf16[2,1,1,128], index: 2, kind: output, shape index: {0}]   ;;  %s1718_s3 = inlined_call_operand.vmem [shape: f32[2,1,2,128], index: 3, kind: output, shape index: {1}]  }
   0x1   :  { %s1482_s14 = smov 0  }
   0x2 LB: > { %s26_s15 = sadd.s32 1, %s1452_s13  ;;  %p988_p0 = scmp.ge.s32.totalorder %s1456_s14, 1  ;;  %s1456_s14 = sphi %s1482_s14, %s14_s14   ;;  %s1452_s13 = sphi %s1480_s13, %s1720_s13   ;;  %s1448_s12 = sphi %s1478_s12, %s1719_s12  }
   0x3   : > { %p28_p1 = scmp.ge.s32.totalorder %s26_s15, 2  ;;  %p155_p2 = scmp.lt.s32.totalorder %s1456_s14, 3 }
   0x5   : > { %s1722_s15 = smov (%p28_p1, %s26_s15), 0  ;;  %p156_p3 = pnand %p988_p0, %p155_p2 }
   0x6   : > { %p186_p4 = scmp.lt.s32.totalorder (!%p156_p3), %s1448_s12, 1 }
   0x7   : > { %159 = sbr.rel (%p156_p3) target bundleno = 219 (0xdb), region = 28 }
   0xc   : > { %v1369_v0 = vld [vmem:[%s1716_s1 + $0xb8] sm:$0xff]  ;;  %v1368_v4 = vld [vmem:[%s1716_s1 + $0xb0] sm:$0xff]  ;;  %s1724_s12 = smov (!%p186_p4, %s1448_s12), 1  ;;  %v1367_v8 = vld [vmem:[%s1716_s1 + $0xa8] sm:$0xff]  ;;  %vm862_vm0 = vcmask 1040384  }
   0xd   : > { %v1377_v1 = vld [vmem:[%s1716_s1 + $0xf8] sm:$0xff]  ;;  %377 = vmatpush.bf16.msra.mxu0 %v1369_v0  ;;  %v1376_v5 = vld [vmem:[%s1716_s1 + $0xf0] sm:$0xff]  ;;  %v1375_v9 = vld [vmem:[%s1716_s1 + $0xe8] sm:$0xff]  ;;  %s989_s17 = sshll.u32 %s1724_s12, 2  ;;  %s990_s7 = sshll.u32 %s1724_s12, 1 }
   0xe   : > { %v1353_v2 = vld [vmem:[%s1716_s1 + $0x38] sm:$0xff]  ;;  %390 = vmatpush.bf16.msra.mxu1 %v1377_v1  ;;  %v1352_v6 = vld [vmem:[%s1716_s1 + $0x30] sm:$0xff]  ;;  %v1351_v10 = vld [vmem:[%s1716_s1 + $0x28] sm:$0xff]  ;;  %s1544_s24 = scalar_lea.vmem %s1715_s0, %s989_s17  ;;  %s195_s10 = scalar_lea.vmem %s1717_s2, %s1724_s12  ;;  %vm863_vm1 = vsmask.f32 256 }
   0xf   : > { %v1361_v3 = vld [vmem:[%s1716_s1 + $0x78] sm:$0xff]  ;;  %504 = vmatpush.bf16.msra.mxu2 %v1353_v2  ;;  %v1360_v7 = vld [vmem:[%s1716_s1 + $0x70] sm:$0xff]  ;;  %v1359_v11 = vld [vmem:[%s1716_s1 + $0x68] sm:$0xff]  ;;  %s202_s17 = scalar_lea.vmem %s1718_s3, %s990_s7 }
  0x10   : > { %517 = vmatpush.bf16.msra.mxu3 %v1361_v3  ;;  %v1366_v12 = vld [vmem:[%s1716_s1 + $0xa0] sm:$0xff]  ;;  %v1365_v17 = vld [vmem:[%s1716_s1 + $0x98] sm:$0xff]  ;;  %v1364_v21 = vld [vmem:[%s1716_s1 + $0x90] sm:$0xff] }
  0x11   : > { %378 = vmatpush.bf16.msra.mxu0 %v1368_v4  ;;  %v1374_v13 = vld [vmem:[%s1716_s1 + $0xe0] sm:$0xff]  ;;  %v1373_v18 = vld [vmem:[%s1716_s1 + $0xd8] sm:$0xff]  ;;  %v1372_v22 = vld [vmem:[%s1716_s1 + $0xd0] sm:$0xff] }
  0x12   : > { %391 = vmatpush.bf16.msra.mxu1 %v1376_v5  ;;  %v1350_v14 = vld [vmem:[%s1716_s1 + $0x20] sm:$0xff]  ;;  %v1349_v19 = vld [vmem:[%s1716_s1 + $0x18] sm:$0xff]  ;;  %v1348_v23 = vld [vmem:[%s1716_s1 + $0x10] sm:$0xff] }
  0x13   : > { %505 = vmatpush.bf16.msra.mxu2 %v1352_v6  ;;  %v1358_v15 = vld [vmem:[%s1716_s1 + $0x60] sm:$0xff]  ;;  %v1357_v20 = vld [vmem:[%s1716_s1 + $0x58] sm:$0xff]  ;;  %v1356_v24 = vld [vmem:[%s1716_s1 + $0x50] sm:$0xff] }
  0x14   : > { %518 = vmatpush.bf16.msra.mxu3 %v1360_v7  ;;  %v205_v16 = vld [vmem:[%s1544_s24] sm:$0x3]  ;;  %v1363_v27 = vld [vmem:[%s1716_s1 + $0x88] sm:$0xff]  ;;  %v1151_v35 = vld [vmem:[%s1544_s24 + $0x2] sm:$0x3] }
  0x15   : > { %379 = vmatpush.bf16.msra.mxu0 %v1367_v8  ;;  %272 = vst [vmem:[#allocation1] ss:$9 sm:$0xff] %v205_v16  ;;  %v1371_v28 = vld [vmem:[%s1716_s1 + $0xc8] sm:$0xff]  ;;  %v1362_v31 = vld [vmem:[%s1716_s1 + $0x80] sm:$0xff]  ;;  %v1385_v36 = vld [vmem:[%s1716_s1 + $0x138] sm:$0xff] }
  0x16   : > { %392 = vmatpush.bf16.msra.mxu1 %v1375_v9  ;;  %v1347_v29 = vld [vmem:[%s1716_s1 + $0x8] sm:$0xff]  ;;  %v1370_v32 = vld [vmem:[%s1716_s1 + $0xc0] sm:$0xff]  ;;  %v1393_v37 = vld [vmem:[%s1716_s1 + $0x178] sm:$0xff] }
  0x17   : > { %506 = vmatpush.bf16.msra.mxu2 %v1351_v10  ;;  %v1355_v30 = vld [vmem:[%s1716_s1 + $0x48] sm:$0xff]  ;;  %v1346_v33 = vld [vmem:[%s1716_s1] sm:$0xff]  ;;  %v1401_v38 = vld [vmem:[%s1716_s1 + $0x1b8] sm:$0xff] }
  0x18   : > { %519 = vmatpush.bf16.msra.mxu3 %v1359_v11  ;;  %v1354_v34 = vld [vmem:[%s1716_s1 + $0x40] sm:$0xff]  ;;  %v1409_v39 = vld [vmem:[%s1716_s1 + $0x1f8] sm:$0xff]  ;;  %v1384_v44 = vld [vmem:[%s1716_s1 + $0x130] sm:$0xff] }
  0x19   : > { %380 = vmatpush.bf16.msra.mxu0 %v1366_v12  ;;  %v1392_v45 = vld [vmem:[%s1716_s1 + $0x170] sm:$0xff]  ;;  %v1383_v48 = vld [vmem:[%s1716_s1 + $0x128] sm:$0xff]  ;;  %v1382_v54 = vld [vmem:[%s1716_s1 + $0x120] sm:$0xff] }
  0x1a   : > { %393 = vmatpush.bf16.msra.mxu1 %v1374_v13  ;;  %v1400_v46 = vld [vmem:[%s1716_s1 + $0x1b0] sm:$0xff]  ;;  %v1391_v49 = vld [vmem:[%s1716_s1 + $0x168] sm:$0xff]  ;;  %v1390_v55 = vld [vmem:[%s1716_s1 + $0x160] sm:$0xff] }
  0x1b   : > { %507 = vmatpush.bf16.msra.mxu2 %v1350_v14  ;;  %v1408_v47 = vld [vmem:[%s1716_s1 + $0x1f0] sm:$0xff]  ;;  %v1399_v50 = vld [vmem:[%s1716_s1 + $0x1a8] sm:$0xff]  ;;  %v1398_v56 = vld [vmem:[%s1716_s1 + $0x1a0] sm:$0xff] }
  0x1c   : > { %520 = vmatpush.bf16.msra.mxu3 %v1358_v15  ;;  %v273_v25 = vld [vmem:[#allocation1] sm:$0xff]  ;;  %v274_v26 = vld [vmem:[#allocation1 + $0x9] sm:$0xff]  ;;  %v1381_v58 = vld [vmem:[%s1716_s1 + $0x118] sm:$0xff] }
  0x1d   : > { %381 = vmatpush.bf16.msra.mxu0 %v1365_v17  ;;  %403 = vst [vmem:[#allocation1] ss:$9 sm:$0xff] %v205_v16  ;;  %v275_v42 = vshrl.u32 %v273_v25, 16  ;;  %v277_v43 = vshrl.u32 %v274_v26, 16  ;;  %v1407_v51 = vld [vmem:[%s1716_s1 + $0x1e8] sm:$0xff]  ;;  %v1406_v57 = vld [vmem:[%s1716_s1 + $0x1e0] sm:$0xff]  ;;  %vm864_vm2 = vmand %vm862_vm0, %vm863_vm1 }
  0x1e   : > { %394 = vmatpush.bf16.msra.mxu1 %v1373_v18  ;;  %v1389_v59 = vld [vmem:[%s1716_s1 + $0x158] sm:$0xff]  ;;  %v1380_v62 = vld [vmem:[%s1716_s1 + $0x110] sm:$0xff]  ;;  %v1379_v2 = vld [vmem:[%s1716_s1 + $0x108] sm:$0xff] }
  0x1f   : > { %508 = vmatpush.bf16.msra.mxu2 %v1349_v19  ;;  %v1397_v60 = vld [vmem:[%s1716_s1 + $0x198] sm:$0xff]  ;;  %v1388_v63 = vld [vmem:[%s1716_s1 + $0x150] sm:$0xff]  ;;  %v1387_v3 = vld [vmem:[%s1716_s1 + $0x148] sm:$0xff] }
  0x20   : > { %521 = vmatpush.bf16.msra.mxu3 %v1357_v20  ;;  %v1405_v61 = vld [vmem:[%s1716_s1 + $0x1d8] sm:$0xff]  ;;  %v1396_v0 = vld [vmem:[%s1716_s1 + $0x190] sm:$0xff]  ;;  %v1395_v4 = vld [vmem:[%s1716_s1 + $0x188] sm:$0xff] }
  0x21   : > { %382 = vmatpush.bf16.msra.mxu0 %v1364_v21  ;;  %v1404_v1 = vld [vmem:[%s1716_s1 + $0x1d0] sm:$0xff]  ;;  %v1403_v5 = vld [vmem:[%s1716_s1 + $0x1c8] sm:$0xff]  ;;  %v1378_v6 = vld [vmem:[%s1716_s1 + $0x100] sm:$0xff] }
  0x22   : > { %395 = vmatpush.bf16.msra.mxu1 %v1372_v22  ;;  %v1386_v7 = vld [vmem:[%s1716_s1 + $0x140] sm:$0xff] }
  0x23   : > { %509 = vmatpush.bf16.msra.mxu2 %v1348_v23  ;;  %v1394_v8 = vld [vmem:[%s1716_s1 + $0x180] sm:$0xff] }
  0x24   : > { %522 = vmatpush.bf16.msra.mxu3 %v1356_v24  ;;  %v404_v40 = vld [vmem:[#allocation1] sm:$0xff]  ;;  %v405_v41 = vld [vmem:[#allocation1 + $0x9] sm:$0xff] }
  0x25   : > { %383 = vmatpush.bf16.msra.mxu0 %v1363_v27  ;;  %568 = vst [vmem:[#allocation1] ss:$9 sm:$0xff] %v1151_v35  ;;  %v1402_v9 = vld [vmem:[%s1716_s1 + $0x1c0] sm:$0xff] }
  0x26   : > { %396 = vmatpush.bf16.msra.mxu1 %v1371_v28 }
  0x27   : > { %510 = vmatpush.bf16.msra.mxu2 %v1347_v29 }
  0x28   : > { %523 = vmatpush.bf16.msra.mxu3 %v1355_v30 }
  0x29   : > { %384 = vmatpush.bf16.msra.mxu0 %v1362_v31 }
  0x2a   : > { %397 = vmatpush.bf16.msra.mxu1 %v1370_v32 }
  0x2b   : > { %511 = vmatpush.bf16.msra.mxu2 %v1346_v33 }
  0x2c   : > { %524 = vmatpush.bf16.msra.mxu3 %v1354_v34  ;;  %385 = vmatmul.bf16.vlgmr.msra.gmra.mxu0 %v275_v42  ;;  %v569_v52 = vld [vmem:[#allocation1] sm:$0xff]  ;;  %v570_v53 = vld [vmem:[#allocation1 + $0x9] sm:$0xff] }
  0x2d   : > { %669 = vmatpush.bf16.msrb.mxu0 %v1385_v36  ;;  %398 = vmatmul.bf16.vlgmr.msra.gmra.mxu1 %v277_v43  ;;  %729 = vst [vmem:[#allocation1] ss:$9 sm:$0xff] %v1151_v35  ;;  %v865_v35 = vld [vmem:[%s195_s10] sm:$0x1] }
  0x2e   : > { %682 = vmatpush.bf16.msrb.mxu1 %v1393_v37  ;;  %512 = vmatmul.bf16.vlgmr.msra.gmra.mxu2 %v404_v40 }
  0x2f   : > { %834 = vmatpush.bf16.msrb.mxu2 %v1401_v38  ;;  %525 = vmatmul.bf16.vlgmr.msra.gmra.mxu3 %v405_v41 }
  0x30   : > { %847 = vmatpush.bf16.msrb.mxu3 %v1409_v39 }
  0x31   : > { %670 = vmatpush.bf16.msrb.mxu0 %v1384_v44 }
  0x32   : > { %683 = vmatpush.bf16.msrb.mxu1 %v1392_v45 }
  0x33   : > { %835 = vmatpush.bf16.msrb.mxu2 %v1400_v46 }
  0x34   : > { %848 = vmatpush.bf16.msrb.mxu3 %v1408_v47  ;;  %v730_v10 = vld [vmem:[#allocation1] sm:$0xff]  ;;  %v731_v11 = vld [vmem:[#allocation1 + $0x9] sm:$0xff] }
  0x35   : > { %671 = vmatpush.bf16.msrb.mxu0 %v1383_v48  ;;  %v732_v12 = vshrl.u32 %v730_v10, 16  ;;  %v734_v13 = vshrl.u32 %v731_v11, 16 }
  0x36   : > { %684 = vmatpush.bf16.msrb.mxu1 %v1391_v49 }
  0x37   : > { %836 = vmatpush.bf16.msrb.mxu2 %v1399_v50 }
  0x38   : > { %849 = vmatpush.bf16.msrb.mxu3 %v1407_v51 }
  0x39   : > { %672 = vmatpush.bf16.msrb.mxu0 %v1382_v54 }
  0x3a   : > { %685 = vmatpush.bf16.msrb.mxu1 %v1390_v55 }
  0x3b   : > { %837 = vmatpush.bf16.msrb.mxu2 %v1398_v56 }
  0x3c   : > { %850 = vmatpush.bf16.msrb.mxu3 %v1406_v57 }
  0x3d   : > { %673 = vmatpush.bf16.msrb.mxu0 %v1381_v58 }
  0x3e   : > { %686 = vmatpush.bf16.msrb.mxu1 %v1389_v59 }
  0x3f   : > { %838 = vmatpush.bf16.msrb.mxu2 %v1397_v60 }
  0x40   : > { %851 = vmatpush.bf16.msrb.mxu3 %v1405_v61 }
  0x41   : > { %674 = vmatpush.bf16.msrb.mxu0 %v1380_v62 }
  0x42   : > { %687 = vmatpush.bf16.msrb.mxu1 %v1388_v63 }
  0x43   : > { %839 = vmatpush.bf16.msrb.mxu2 %v1396_v0 }
  0x44   : > { %852 = vmatpush.bf16.msrb.mxu3 %v1404_v1 }
  0x45   : > { %675 = vmatpush.bf16.msrb.mxu0 %v1379_v2 }
  0x46   : > { %688 = vmatpush.bf16.msrb.mxu1 %v1387_v3 }
  0x47   : > { %840 = vmatpush.bf16.msrb.mxu2 %v1395_v4 }
  0x48   : > { %853 = vmatpush.bf16.msrb.mxu3 %v1403_v5 }
  0x49   : > { %676 = vmatpush.bf16.msrb.mxu0 %v1378_v6 }
  0x4a   : > { %689 = vmatpush.bf16.msrb.mxu1 %v1386_v7 }
  0x4b   : > { %841 = vmatpush.bf16.msrb.mxu2 %v1394_v8 }
  0x4c   : > { %854 = vmatpush.bf16.msrb.mxu3 %v1402_v9  ;;  %677 = vmatmul.bf16.vlgmr.msrb.gmra.mxu0 %v569_v52 }
  0x4d   : > { %690 = vmatmul.bf16.vlgmr.msrb.gmra.mxu1 %v570_v53 }
  0x4e   : > { %842 = vmatmul.bf16.vlgmr.msrb.gmra.mxu2 %v732_v12 }
  0x4f   : > { %855 = vmatmul.bf16.vlgmr.msrb.gmra.mxu3 %v734_v13 }
  0xa9   : > { %v386_v14 = vpop.f32.mrf.mxu0 }
  0xaa   : > { %v399_v15 = vpop.f32.mrf.mxu1 }
  0xab   : > { %v400_v22 = vadd.f32 %v399_v15, %v386_v14 }
  0xb1   : > { %v513_v16 = vpop.f32.mrf.mxu2  ;;  %v388_v18 = vpop.f32.mrf.mxu0 }
  0xb2   : > { %v526_v17 = vpop.f32.mrf.mxu3  ;;  %v401_v19 = vpop.f32.mrf.mxu1  ;;  %v514_v25 = vadd.f32 %v513_v16, %v400_v22 }
  0xb4   : > { %v527_v27 = vadd.f32 %v526_v17, %v514_v25 }
  0xb9   : > { %v515_v20 = vpop.f32.mrf.mxu2 }
  0xba   : > { %v528_v21 = vpop.f32.mrf.mxu3 }
  0xc9   : > { %v678_v23 = vpop.f32.mrf.mxu0 }
  0xca   : > { %v691_v24 = vpop.f32.mrf.mxu1 }
  0xcb   : > { %v692_v26 = vadd.f32 %v691_v24, %v678_v23 }
  0xcd   : > { %v695_v30 = vadd.f32 %v692_v26, %v527_v27 }
  0xd1   : > { %v843_v28 = vpop.f32.mrf.mxu2  ;;  %v680_v32 = vpop.f32.mrf.mxu0 }
  0xd2   : > { %v856_v29 = vpop.f32.mrf.mxu3  ;;  %v693_v33 = vpop.f32.mrf.mxu1 }
  0xd3   : > { %v857_v31 = vadd.f32 %v856_v29, %v843_v28 }
  0xd5   : > { %v860_v34 = vadd.f32 %v857_v31, %v695_v30 }
  0xd7   : > { %v861_v36 = vpack.c.bf16 %v860_v34, %v860_v34  ;;  %869 = vst [vmem:[%s202_s17] sm:$0x1] %v860_v34  ;;  %v870_v37 = vmul.f32 %v860_v34, %v860_v34 }
  0xd9   : > { %v866_v38 = vsel %vm864_vm2, %v861_v36, %v865_v35  ;;  %872 = vst [vmem:[%s202_s17 + $0x1] sm:$0x1] %v870_v37  ;;  %v845_v39 = vpop.f32.mrf.mxu2 }
  0xda   : > { %867 = vst [vmem:[%s195_s10] sm:$0x1] %v866_v38  ;;  %v858_v40 = vpop.f32.mrf.mxu3 }
  0xdb PF: > { %s14_s14 = sadd.s32 1, %s1456_s14   ;;  %s1719_s12 = smov %s1452_s13 }
  0xdc   : > { %p11_p5 = scmp.ge.s32.totalorder %s14_s14, 4   ;;  %s1720_s13 = smov %s1722_s15 }
  0xde   :  { %13 = sbr.rel (!%p11_p5) target bundleno = 2 (0x2), region = 75 }

</bundles_post_ra>
